<compile_context>
chip_gen: v6e
topology: v6e:2x2x1
jax: 0.10.0
libtpu: 0.0.40
codegen_flags: <defaults>
</compile_context>

<pallas_src>
import jax
import jax.numpy as jnp
import numpy as np
from jax import lax
from jax.experimental import pallas as pl
from jax.experimental.pallas import tpu as pltpu


# --------------------------------------------------------------------------
# Kernel
# --------------------------------------------------------------------------
def basic_block_kernel(x_ref, w1_ref, w2_ref, bias_ref, out_ref):
    # x_ref   : (B, H, W*Cin)     bf16  B images, rows flattened as (x, ci)
    # w1_ref  : (3, W*Cin, W*C)   bf16  banded conv1 weights (BN1 scale folded)
    # w2_ref  : (3, W*C,  W*C)    bf16  banded conv2 weights (BN2 scale folded)
    # bias_ref: (2, W*C)          f32   folded BN biases (row0: bn1, row1: bn2)
    # out_ref : (B, H, W*C)       f32
    B, H, K1 = x_ref.shape
    Wn = out_ref.shape[2]
    mxu = w1_ref.dtype

    def conv3x3_banded(act, w_ref):
        # act: (B, H, K) in the MXU dtype.  The kx taps + x zero-padding live
        # in the banded weights; the ky taps are three accumulating MXU dots
        # on per-image row-shifted views (zero 1-row halo built in-register).
        K = act.shape[-1]
        Bh = B * H
        zrow = jnp.zeros((B, 1, K), mxu)
        up = jnp.concatenate([zrow, act[:, :H - 1, :]], axis=1)   # input row y-1
        dn = jnp.concatenate([act[:, 1:, :], zrow], axis=1)       # input row y+1
        acc = jnp.dot(up.reshape(Bh, K), w_ref[0],
                      preferred_element_type=jnp.float32)
        acc += jnp.dot(act.reshape(Bh, K), w_ref[1],
                       preferred_element_type=jnp.float32)
        acc += jnp.dot(dn.reshape(Bh, K), w_ref[2],
                       preferred_element_type=jnp.float32)
        return acc                                                # (B*H, Wn) f32

    x_b = x_ref[...]                                              # (B, H, K1) bf16

    # ---- conv1 + bn1 + relu : scale lives in w1, only bias-add + relu here.
    h = jnp.maximum(conv3x3_banded(x_b, w1_ref) + bias_ref[0:1, :], 0.0)

    # ---- conv2 + bn2 : cast h to the MXU dtype once.
    o = conv3x3_banded(h.astype(mxu).reshape(B, H, Wn), w2_ref) + bias_ref[1:2, :]

    # ---- residual add + relu (f32 epilogue), lane-dense unmasked store.
    x_f = x_b.reshape(B * H, K1).astype(jnp.float32)
    out_ref[...] = jnp.maximum(o + x_f, 0.0).reshape(B, H, Wn).astype(out_ref.dtype)


# --------------------------------------------------------------------------
# Wrapper helpers
# --------------------------------------------------------------------------
def _band_weights(w_oihw, W, scale):
    """Fold kx taps + x zero-padding + per-Cout BN scale of a 3x3 conv into
    three (W*Cin, W*Cout) blocks ordered by ky.

    band[ky, p*Cin + ci, x*Cout + co] = scale[co] * w[co, ci, ky, p - x + 1]
    when |p - x| <= 1, else 0 (edge taps dropped == SAME zero padding).
    """
    Cout, Cin, _, _ = w_oihw.shape
    w = jnp.transpose(w_oihw, (2, 3, 1, 0)).astype(jnp.float32)   # (ky, kx, ci, co)
    w = w * scale                                                 # fold BN scale
    d = jnp.arange(3)[:, None, None]
    p = jnp.arange(W)[None, :, None]
    x = jnp.arange(W)[None, None, :]
    sel = (p == x + d - 1).astype(jnp.float32)                    # (kx, p, x)
    band = jnp.einsum('dpx,kdio->kpixo', sel, w,
                      precision=lax.Precision.HIGHEST)            # (ky, W, Cin, W, Cout)
    return band.reshape(3, W * Cin, W * Cout)


def _fold_bn(bn, eps):
    gamma, beta, mean, var = bn
    scale = gamma * lax.rsqrt(var + eps)
    return scale, beta - mean * scale


def _pick_block_n(N, H, target_rows):
    """Largest divisor of N with block_n * H <= max(target_rows, H)."""
    best, cap = 1, max(target_rows, H)
    for b in range(1, N + 1):
        if N % b == 0 and b * H <= cap:
            best = b
    return best


# --------------------------------------------------------------------------
# Wrapper
# --------------------------------------------------------------------------
def basic_block_pallas(x_nchw, w1_oihw, w2_oihw, bn1, bn2, eps=1e-5,
                       block_n=None, target_rows=256):
    """BasicBlock forward (stride=1, downsample=None). x_nchw: (N, C, H, W)."""
    N, Cin, H, W = x_nchw.shape
    C = w1_oihw.shape[0]
    assert Cin == C, "identity path requires inplanes == planes (no downsample)"
    assert (W * C) % 128 == 0, "lane-dense layout wants W*C to be a multiple of 128"
    if block_n is None:
        block_n = _pick_block_n(N, H, target_rows)
    assert N % block_n == 0

    # NCHW -> (N, H, W*Cin), bf16 MXU feed (no HBM-side padding).
    x_rows = jnp.transpose(x_nchw, (0, 2, 3, 1)).reshape(N, H, W * Cin)
    x_rows = x_rows.astype(jnp.bfloat16)

    s1, b1 = _fold_bn(bn1, eps)
    s2, b2 = _fold_bn(bn2, eps)
    w1_band = _band_weights(w1_oihw, W, s1).astype(jnp.bfloat16)  # (3, W*Cin, W*C)
    w2_band = _band_weights(w2_oihw, W, s2).astype(jnp.bfloat16)  # (3, W*C,  W*C)
    biases = jnp.stack([jnp.tile(b1, W), jnp.tile(b2, W)]).astype(jnp.float32)

    k1, Wn = W * Cin, W * C
    cost = pl.CostEstimate(
        flops=2 * N * H * 3 * (k1 + Wn) * Wn,
        transcendentals=0,
        bytes_accessed=(x_rows.size * 2 + w1_band.size * 2 + w2_band.size * 2
                        + biases.size * 4 + N * H * Wn * 4))

    out_rows = pl.pallas_call(
        basic_block_kernel,
        out_shape=jax.ShapeDtypeStruct((N, H, Wn), jnp.float32),
        grid_spec=pltpu.PrefetchScalarGridSpec(
            num_scalar_prefetch=0,
            grid=(N // block_n,),
            in_specs=[
                pl.BlockSpec((block_n, H, k1), lambda n: (n, 0, 0)),
                pl.BlockSpec((3, k1, Wn), lambda n: (0, 0, 0)),
                pl.BlockSpec((3, Wn, Wn), lambda n: (0, 0, 0)),
                pl.BlockSpec((2, Wn), lambda n: (0, 0)),
            ],
            out_specs=pl.BlockSpec((block_n, H, Wn), lambda n: (n, 0, 0)),
        ),
        compiler_params=pltpu.CompilerParams(
            dimension_semantics=("parallel",)),
        cost_estimate=cost,
    )(x_rows, w1_band, w2_band, biases)

    # (N, H, W*C) -> NCHW
    return jnp.transpose(out_rows.reshape(N, H, W, C), (0, 3, 1, 2))


# --------------------------------------------------------------------------
# Pure-JAX reference (BN folded form; mathematically identical to the module)
# --------------------------------------------------------------------------
def basic_block_ref(x_nchw, w1_oihw, w2_oihw, bn1, bn2, eps=1e-5,
                    mxu_dtype=None):
    """Reference. If mxu_dtype is set, mirror the kernel's bf16 MXU rounding."""
    x = jnp.transpose(x_nchw, (0, 2, 3, 1)).astype(jnp.float32)
    s1, b1 = _fold_bn(bn1, eps)
    s2, b2 = _fold_bn(bn2, eps)
    w1 = jnp.transpose(w1_oihw, (2, 3, 1, 0)).astype(jnp.float32) * s1
    w2 = jnp.transpose(w2_oihw, (2, 3, 1, 0)).astype(jnp.float32) * s2
    if mxu_dtype is not None:
        rnd = lambda a: a.astype(mxu_dtype).astype(jnp.float32)
        x, w1, w2 = rnd(x), rnd(w1), rnd(w2)

    dn = ('NHWC', 'HWIO', 'NHWC')
    conv = lambda a, w: lax.conv_general_dilated(
        a, w, (1, 1), 'SAME', dimension_numbers=dn,
        precision=lax.Precision.HIGHEST, preferred_element_type=jnp.float32)

    h = jnp.maximum(conv(x, w1) + b1, 0.0)
    if mxu_dtype is not None:
        h = h.astype(mxu_dtype).astype(jnp.float32)
    o = conv(h, w2) + b2
    o = jnp.maximum(o + x, 0.0)      # identity path (rounded copy when mirrored)
    return jnp.transpose(o, (0, 3, 1, 2))


# --------------------------------------------------------------------------
if __name__ == "__main__":
    # inplanes = planes = 8, stride = 1, W*C = 128 lanes; batch 32 so each
    # grid step batches 16 images -> M = 256 rows per MXU dot, grid = (2,).
    N, C, H, W = 32, 8, 16, 16

    key = jax.random.PRNGKey(0)
    keys = jax.random.split(key, 11)

    x = jax.random.normal(keys[0], (N, C, H, W), jnp.float32)

    # conv weights, PyTorch OIHW shape (out, in, 3, 3), bias=False
    w1 = jax.random.normal(keys[1], (C, C, 3, 3), jnp.float32) * 0.1
    w2 = jax.random.normal(keys[2], (C, C, 3, 3), jnp.float32) * 0.1

    # synthetic BatchNorm params (gamma, beta, running_mean, running_var)
    bn1 = (jax.random.uniform(keys[3], (C,), jnp.float32, 0.5, 1.5),
           jax.random.normal(keys[4], (C,), jnp.float32) * 0.1,
           jax.random.normal(keys[5], (C,), jnp.float32) * 0.1,
           jax.random.uniform(keys[6], (C,), jnp.float32, 0.5, 1.5))
    bn2 = (jax.random.uniform(keys[7], (C,), jnp.float32, 0.5, 1.5),
           jax.random.normal(keys[8], (C,), jnp.float32) * 0.1,
           jax.random.normal(keys[9], (C,), jnp.float32) * 0.1,
           jax.random.uniform(keys[10], (C,), jnp.float32, 0.5, 1.5))

    out = jax.block_until_ready(basic_block_pallas(x, w1, w2, bn1, bn2))

    # Tight check: reference with the same bf16 MXU-input rounding.
    ref_bf16 = jax.block_until_ready(
        basic_block_ref(x, w1, w2, bn1, bn2, mxu_dtype=jnp.bfloat16))
    np.testing.assert_allclose(np.asarray(out), np.asarray(ref_bf16),
                               rtol=1e-2, atol=1e-2)

    # Loose sanity check against the exact f32 module semantics
    # (difference is only bf16 rounding of MXU inputs / identity copy).
    ref_f32 = jax.block_until_ready(basic_block_ref(x, w1, w2, bn1, bn2))
    np.testing.assert_allclose(np.asarray(out), np.asarray(ref_f32),
                               rtol=1e-1, atol=2.5e-1)

    print("KERNEL_OK")
</pallas_src>

<mosaic_0001>
module attributes {stable_mosaic.version = 11 : i64} {
  func.func @basic_block_kernel(%arg0: i32, %arg1: memref<16x16x128xbf16, #tpu.memory_space<vmem>>, %arg2: memref<3x128x128xbf16, #tpu.memory_space<vmem>>, %arg3: memref<3x128x128xbf16, #tpu.memory_space<vmem>>, %arg4: memref<2x128xf32, #tpu.memory_space<vmem>>, %arg5: memref<16x16x128xf32, #tpu.memory_space<vmem>>) attributes {dimension_semantics = [#tpu.dimension_semantics<parallel>], iteration_bounds = array<i64: 2>, scalar_prefetch = 0 : i64, scratch_operands = 0 : i64, tpu.core_type = #tpu.core_type<tc>, window_params = [{transform_indices = @transform_0, window_bounds = array<i64: 16, 16, 128>}, {pipeline_mode = #tpu.pipeline_mode<synchronous>, transform_indices = @transform_1, window_bounds = array<i64: 3, 128, 128>}, {pipeline_mode = #tpu.pipeline_mode<synchronous>, transform_indices = @transform_2, window_bounds = array<i64: 3, 128, 128>}, {pipeline_mode = #tpu.pipeline_mode<synchronous>, transform_indices = @transform_3, window_bounds = array<i64: 2, 128>}, {transform_indices = @transform_4, window_bounds = array<i64: 16, 16, 128>}]} {
    %c0 = arith.constant 0 : index
    %c0_0 = arith.constant 0 : index
    %c0_1 = arith.constant 0 : index
    %0 = vector.load %arg1[%c0, %c0_0, %c0_1] : memref<16x16x128xbf16, #tpu.memory_space<vmem>>, vector<16x16x128xbf16>
    %cst = arith.constant 0.000000e+00 : bf16
    %1 = vector.broadcast %cst : bf16 to vector<16x1x128xbf16>
    %2 = vector.extract_strided_slice %0 {offsets = [0, 0, 0], sizes = [16, 15, 128], strides = [1, 1, 1]} : vector<16x16x128xbf16> to vector<16x15x128xbf16>
    %3 = tpu.concatenate %1, %2 in 1 : vector<16x1x128xbf16>, vector<16x15x128xbf16> -> vector<16x16x128xbf16>
    %4 = vector.extract_strided_slice %0 {offsets = [0, 1, 0], sizes = [16, 15, 128], strides = [1, 1, 1]} : vector<16x16x128xbf16> to vector<16x15x128xbf16>
    %5 = tpu.concatenate %4, %1 in 1 : vector<16x15x128xbf16>, vector<16x1x128xbf16> -> vector<16x16x128xbf16>
    %6 = vector.shape_cast %3 : vector<16x16x128xbf16> to vector<256x128xbf16>
    %c0_2 = arith.constant 0 : index
    %c0_3 = arith.constant 0 : index
    %c0_4 = arith.constant 0 : index
    %7 = vector.load %arg2[%c0_2, %c0_3, %c0_4] : memref<3x128x128xbf16, #tpu.memory_space<vmem>>, vector<1x128x128xbf16>
    %8 = vector.shape_cast %7 : vector<1x128x128xbf16> to vector<128x128xbf16>
    %cst_5 = arith.constant dense<0.000000e+00> : vector<256x128xf32>
    %9 = tpu.matmul %6, %8, %cst_5 {dimension_numbers = #tpu.dot_dimension_numbers<[1], [0], [0], [1], [0, 0, 1, 1], [], []>} : vector<256x128xbf16>, vector<128x128xbf16>, vector<256x128xf32> -> vector<256x128xf32>
    %10 = vector.shape_cast %0 : vector<16x16x128xbf16> to vector<256x128xbf16>
    %c1 = arith.constant 1 : index
    %c0_6 = arith.constant 0 : index
    %c0_7 = arith.constant 0 : index
    %11 = vector.load %arg2[%c1, %c0_6, %c0_7] : memref<3x128x128xbf16, #tpu.memory_space<vmem>>, vector<1x128x128xbf16>
    %12 = vector.shape_cast %11 : vector<1x128x128xbf16> to vector<128x128xbf16>
    %cst_8 = arith.constant dense<0.000000e+00> : vector<256x128xf32>
    %13 = tpu.matmul %10, %12, %cst_8 {dimension_numbers = #tpu.dot_dimension_numbers<[1], [0], [0], [1], [0, 0, 1, 1], [], []>} : vector<256x128xbf16>, vector<128x128xbf16>, vector<256x128xf32> -> vector<256x128xf32>
    %14 = arith.addf %9, %13 : vector<256x128xf32>
    %15 = vector.shape_cast %5 : vector<16x16x128xbf16> to vector<256x128xbf16>
    %c2 = arith.constant 2 : index
    %c0_9 = arith.constant 0 : index
    %c0_10 = arith.constant 0 : index
    %16 = vector.load %arg2[%c2, %c0_9, %c0_10] : memref<3x128x128xbf16, #tpu.memory_space<vmem>>, vector<1x128x128xbf16>
    %17 = vector.shape_cast %16 : vector<1x128x128xbf16> to vector<128x128xbf16>
    %cst_11 = arith.constant dense<0.000000e+00> : vector<256x128xf32>
    %18 = tpu.matmul %15, %17, %cst_11 {dimension_numbers = #tpu.dot_dimension_numbers<[1], [0], [0], [1], [0, 0, 1, 1], [], []>} : vector<256x128xbf16>, vector<128x128xbf16>, vector<256x128xf32> -> vector<256x128xf32>
    %19 = arith.addf %14, %18 : vector<256x128xf32>
    %c0_12 = arith.constant 0 : index
    %c0_13 = arith.constant 0 : index
    %20 = vector.load %arg4[%c0_12, %c0_13] : memref<2x128xf32, #tpu.memory_space<vmem>>, vector<1x128xf32>
    %21 = vector.broadcast %20 : vector<1x128xf32> to vector<256x128xf32>
    %22 = arith.addf %19, %21 : vector<256x128xf32>
    %cst_14 = arith.constant 0.000000e+00 : f32
    %23 = vector.broadcast %cst_14 : f32 to vector<256x128xf32>
    %24 = arith.maximumf %22, %23 : vector<256x128xf32>
    %25 = arith.truncf %24 : vector<256x128xf32> to vector<256x128xbf16>
    %26 = vector.shape_cast %25 : vector<256x128xbf16> to vector<16x16x128xbf16>
    %cst_15 = arith.constant 0.000000e+00 : bf16
    %27 = vector.broadcast %cst_15 : bf16 to vector<16x1x128xbf16>
    %28 = vector.extract_strided_slice %26 {offsets = [0, 0, 0], sizes = [16, 15, 128], strides = [1, 1, 1]} : vector<16x16x128xbf16> to vector<16x15x128xbf16>
    %29 = tpu.concatenate %27, %28 in 1 : vector<16x1x128xbf16>, vector<16x15x128xbf16> -> vector<16x16x128xbf16>
    %30 = vector.extract_strided_slice %26 {offsets = [0, 1, 0], sizes = [16, 15, 128], strides = [1, 1, 1]} : vector<16x16x128xbf16> to vector<16x15x128xbf16>
    %31 = tpu.concatenate %30, %27 in 1 : vector<16x15x128xbf16>, vector<16x1x128xbf16> -> vector<16x16x128xbf16>
    %32 = vector.shape_cast %29 : vector<16x16x128xbf16> to vector<256x128xbf16>
    %c0_16 = arith.constant 0 : index
    %c0_17 = arith.constant 0 : index
    %c0_18 = arith.constant 0 : index
    %33 = vector.load %arg3[%c0_16, %c0_17, %c0_18] : memref<3x128x128xbf16, #tpu.memory_space<vmem>>, vector<1x128x128xbf16>
    %34 = vector.shape_cast %33 : vector<1x128x128xbf16> to vector<128x128xbf16>
    %cst_19 = arith.constant dense<0.000000e+00> : vector<256x128xf32>
    %35 = tpu.matmul %32, %34, %cst_19 {dimension_numbers = #tpu.dot_dimension_numbers<[1], [0], [0], [1], [0, 0, 1, 1], [], []>} : vector<256x128xbf16>, vector<128x128xbf16>, vector<256x128xf32> -> vector<256x128xf32>
    %36 = vector.shape_cast %26 : vector<16x16x128xbf16> to vector<256x128xbf16>
    %c1_20 = arith.constant 1 : index
    %c0_21 = arith.constant 0 : index
    %c0_22 = arith.constant 0 : index
    %37 = vector.load %arg3[%c1_20, %c0_21, %c0_22] : memref<3x128x128xbf16, #tpu.memory_space<vmem>>, vector<1x128x128xbf16>
    %38 = vector.shape_cast %37 : vector<1x128x128xbf16> to vector<128x128xbf16>
    %cst_23 = arith.constant dense<0.000000e+00> : vector<256x128xf32>
    %39 = tpu.matmul %36, %38, %cst_23 {dimension_numbers = #tpu.dot_dimension_numbers<[1], [0], [0], [1], [0, 0, 1, 1], [], []>} : vector<256x128xbf16>, vector<128x128xbf16>, vector<256x128xf32> -> vector<256x128xf32>
    %40 = arith.addf %35, %39 : vector<256x128xf32>
    %41 = vector.shape_cast %31 : vector<16x16x128xbf16> to vector<256x128xbf16>
    %c2_24 = arith.constant 2 : index
    %c0_25 = arith.constant 0 : index
    %c0_26 = arith.constant 0 : index
    %42 = vector.load %arg3[%c2_24, %c0_25, %c0_26] : memref<3x128x128xbf16, #tpu.memory_space<vmem>>, vector<1x128x128xbf16>
    %43 = vector.shape_cast %42 : vector<1x128x128xbf16> to vector<128x128xbf16>
    %cst_27 = arith.constant dense<0.000000e+00> : vector<256x128xf32>
    %44 = tpu.matmul %41, %43, %cst_27 {dimension_numbers = #tpu.dot_dimension_numbers<[1], [0], [0], [1], [0, 0, 1, 1], [], []>} : vector<256x128xbf16>, vector<128x128xbf16>, vector<256x128xf32> -> vector<256x128xf32>
    %45 = arith.addf %40, %44 : vector<256x128xf32>
    %c1_28 = arith.constant 1 : index
    %c0_29 = arith.constant 0 : index
    %46 = vector.load %arg4[%c1_28, %c0_29] : memref<2x128xf32, #tpu.memory_space<vmem>>, vector<1x128xf32>
    %47 = vector.broadcast %46 : vector<1x128xf32> to vector<256x128xf32>
    %48 = arith.addf %45, %47 : vector<256x128xf32>
    %49 = vector.shape_cast %0 : vector<16x16x128xbf16> to vector<256x128xbf16>
    %50 = arith.extf %49 : vector<256x128xbf16> to vector<256x128xf32>
    %51 = arith.addf %48, %50 : vector<256x128xf32>
    %cst_30 = arith.constant 0.000000e+00 : f32
    %52 = vector.broadcast %cst_30 : f32 to vector<256x128xf32>
    %53 = arith.maximumf %51, %52 : vector<256x128xf32>
    %54 = vector.shape_cast %53 : vector<256x128xf32> to vector<16x16x128xf32>
    %c0_31 = arith.constant 0 : index
    %c0_32 = arith.constant 0 : index
    %c0_33 = arith.constant 0 : index
    %55 = vector.load %arg5[%c0_31, %c0_32, %c0_33] : memref<16x16x128xf32, #tpu.memory_space<vmem>>, vector<16x16x128xf32>
    tpu.vector_store %arg5[%c0_31, %c0_32, %c0_33], %54 {strides = array<i32>} : memref<16x16x128xf32, #tpu.memory_space<vmem>>, vector<16x16x128xf32>,
    return
  }
  func.func @transform_0(%arg0: i32) -> (i32, i32, i32) {
    %c0_i32 = arith.constant 0 : i32
    %c0_i32_0 = arith.constant 0 : i32
    %c0_i32_1 = arith.constant 0 : i32
    return %arg0, %c0_i32, %c0_i32_0 : i32, i32, i32
  }
  func.func @transform_1(%arg0: i32) -> (i32, i32, i32) {
    %c0_i32 = arith.constant 0 : i32
    %c0_i32_0 = arith.constant 0 : i32
    %c0_i32_1 = arith.constant 0 : i32
    %c0_i32_2 = arith.constant 0 : i32
    return %c0_i32, %c0_i32_0, %c0_i32_1 : i32, i32, i32
  }
  func.func @transform_2(%arg0: i32) -> (i32, i32, i32) {
    %c0_i32 = arith.constant 0 : i32
    %c0_i32_0 = arith.constant 0 : i32
    %c0_i32_1 = arith.constant 0 : i32
    %c0_i32_2 = arith.constant 0 : i32
    return %c0_i32, %c0_i32_0, %c0_i32_1 : i32, i32, i32
  }
  func.func @transform_3(%arg0: i32) -> (i32, i32) {
    %c0_i32 = arith.constant 0 : i32
    %c0_i32_0 = arith.constant 0 : i32
    %c0_i32_1 = arith.constant 0 : i32
    return %c0_i32, %c0_i32_0 : i32, i32
  }
  func.func @transform_4(%arg0: i32) -> (i32, i32, i32) {
    %c0_i32 = arith.constant 0 : i32
    %c0_i32_0 = arith.constant 0 : i32
    %c0_i32_1 = arith.constant 0 : i32
    return %arg0, %c0_i32, %c0_i32_0 : i32, i32, i32
  }
}

</mosaic_0001>

<bundles_post_ra>
// kernel: tpu_custom_call.1
= control target key start
LH: loop header
LB: loop body
LE: loop exit
PB: predicated region body
PF: predicated region fallthrough
CT: control target
= control target key end

     0   :  { %9 = vsyncpa [#allocation3], 0  ;;  %s4623_s0 = inlined_call_operand.hbm [shape: bf16[32,16,128], index: 0, kind: input, shape index: {}]   ;;  %s4624_s1 = inlined_call_operand.hbm [shape: bf16[3,128,128], index: 1, kind: input, shape index: {}]   ;;  %s4625_s2 = inlined_call_operand.hbm [shape: bf16[3,128,128], index: 2, kind: input, shape index: {}]   ;;  %s4626_s3 = inlined_call_operand.vmem [shape: f32[2,128], index: 3, kind: input, shape index: {}]   ;;  %s4627_s4 = inlined_call_operand.hbm [shape: f32[32,16,128], index: 4, kind: output, shape index: {}]  }
   0x1   :  { %11 = vsyncpa [#allocation3 + $0x1], 0 }
   0x2   :  { %12 = vsyncpa [#allocation6], 0 }
   0x3   :  { %13 = vsyncpa [#allocation4], 0 }
   0x4   :  { %15 = vsyncpa [#allocation4 + $0x1], 0  ;;  %s3446_s15 = smov 0   ;;  %s3448_s16 = smov 0  }
   0x5   :  { %s3450_s17 = smov 0   ;;  %s3452_s18 = smov 0  }
   0x6 LB: > { %s3467_s19 = sadd.s32 4294967295, %s3411_s18   ;;  %s2574_s20 = sadd.s32 4294967294, %s3411_s18   ;;  %s3411_s18 = sphi %s3452_s18, %s4670_s18   ;;  %s3407_s17 = sphi %s3450_s17, %s4669_s17   ;;  %s3403_s16 = sphi %s3448_s16, %s4668_s16   ;;  %s3399_s15 = sphi %s3446_s15, %s4667_s15  }
   0x7   : > { %p41_p0 = scmp.ne.s32.totalorder %s3403_s16, %s3399_s15  ;;  %p4628_p1 = scmp.eq.s32.totalorder %s3467_s19, 0 }
   0x8   : > { %p128_p2 = scmp.eq.s32.totalorder %s3467_s19, 1  ;;  %p134_p3 = scmp.eq.s32.totalorder %s2574_s20, 1 }
   0x9   : > { %p3476_p4 = por %p4628_p1, %p41_p0  ;;  %p2575_p5 = scmp.ge.s32.totalorder %s3411_s18, 1 }
   0xa   : > { %p3481_p6 = por %p134_p3, %p41_p0  ;;  %p141_p7 = scmp.lt.s32.totalorder %s3411_s18, 3 }
   0xb   : > { %s4634_s21 = scalar_select %p3476_p4, 1, 0 }
   0xc   : > { %s4635_s22 = scalar_select %p3481_p6, 1, 0 }
   0xd   : > { %p3486_p8 = pnand %p2575_p5, %p141_p7  ;;  %s3413_s24 = smov [#allocation5]  }
   0xe   : > { %s153_s25 = sshll.u32 %s3413_s24, 4  ;;  %s3414_s27 = smov [#allocation7]   ;;  %s154_s25 = int_to_ptr.vmem [resolvable:$true] %s153_s25 }
   0xf   : > { %s4636_s23 = scalar_select %p3486_p8, 1, 0 }
  0x10   : > { %p3108_p9 = pneg %p3486_p8  ;;  %s166_s28 = sshll.u32 %s3414_s27, 4  ;;  %s167_s28 = int_to_ptr.vmem [resolvable:$true] %s166_s28 }
  0x11   : > { %s3274_s29 = scalar_lea.vmem %s154_s25, 3072  ;;  %p3282_p5 = scmp.lt.s32.totalorder %s154_s25, %s154_s25 }
  0x12   : > { %p3495_p11 = pnand %p3108_p9, %p4628_p1  ;;  %p3275_p13 = scmp.ne.s32.totalorder %s154_s25, %s3274_s29 }
  0x13   : > { %p3283_p7 = scmp.lt.s32.totalorder %s3274_s29, %s3274_s29 }
  0x14   : > { %p3265_p12 = pneg %p3495_p11 }
  0x15   : > { %p3284_p10 = por %p3283_p7, %p3282_p5 }
  0x16   : > { %p3277_p0 = pnand %p3275_p13, %p3265_p12 }
  0x18   : > { %p3278_p3 = pneg %p3277_p0 }
  0x1a   : > { %p3285_p9 = pnand %p3284_p10, %p3278_p3 }
  0x1c   : > { %3288 = shalt.err (!%p3285_p9)
}
  0x1d   : > { %s3415_s30 = smov 64   ;;  %s3416_s5 = smov 4  }
  0x1e   : > { %3111 = dma.hbm_to_vmem [thread:$0]  (!%p3495_p11), %s4624_s1, 3072, %s154_s25, [#allocation6], %s3415_s30, %s3415_s30, %s3416_s5  }
  0x1f   : > { %s3300_s8 = scalar_lea.vmem %s167_s28, 3072  ;;  %p3308_p10 = scmp.lt.s32.totalorder %s167_s28, %s167_s28 }
  0x20   : > { %p3301_p13 = scmp.ne.s32.totalorder %s167_s28, %s3300_s8  ;;  %p3309_p3 = scmp.lt.s32.totalorder %s3300_s8, %s3300_s8 }
  0x22   : > { %p3303_p0 = pnand %p3301_p13, %p3265_p12  ;;  %p3310_p7 = por %p3309_p3, %p3308_p10 }
  0x24   : > { %p3304_p5 = pneg %p3303_p0 }
  0x26   : > { %p3311_p9 = pnand %p3310_p7, %p3304_p5 }
  0x28   : > { %3314 = shalt.err (!%p3311_p9)
}
  0x29   : > { %3114 = dma.hbm_to_vmem [thread:$0]  (!%p3495_p11), %s4625_s2, 3072, %s167_s28, [#allocation6], %s3415_s30, %s3415_s30, %s3416_s5  }
  0x2a   : > { %s3524_s11 = sadd.s32 1, %s3411_s18   ;;  %s28_s12 = sadd.s32 1, %s3407_s17 }
  0x2b   : > { %s25_s13 = ssub.s32 %s3411_s18, %s3524_s11  ;;  %p35_p12 = scmp.ne.s32.totalorder %s3407_s17, %s3403_s16 }
  0x2c   : > { %p26_p13 = scmp.eq.s32.totalorder %s25_s13, 0  ;;  %p36_p0 = scmp.eq.s32.totalorder %s3411_s18, 0 }
  0x2d   : > { %p3534_p5 = por %p128_p2, %p35_p12  ;;  %p3125_p10 = scmp.lt.s32.totalorder %s3411_s18, 2 }
  0x2e   : > { %s3540_s20 = scalar_select %p26_p13, %s3407_s17, %s28_s12  }
  0x2f   : > { %s4638_s14 = scalar_select %p3534_p5, 1, 0 }
  0x30   : > { %p37_p3 = por %p36_p0, %p35_p12  ;;  %s183_s24 = sand.u32 1, %s3407_s17  }
  0x31   : > { %s2579_s25 = sshll.u32 %s183_s24, 7  ;;  %s2661_s26 = sshll.u32 %s3411_s18, 11 }
  0x32   : > { %s3547_s29 = scalar_lea.hbm %s4623_s0, %s2661_s26  ;;  %s187_s6 = scalar_lea.vmem [#allocation2], %s2579_s25 }
  0x33   : > { %s195_s7 = sshll.u32 %s187_s6, 4  ;;  %p3551_p2 = pnand %p3125_p10, %p37_p3  ;;  %s3549_s7 = int_to_ptr.vmem [resolvable:$true] %s195_s7 }
  0x34   : > { %s3555_s9 = scalar_lea.sflag [#allocation3], %s183_s24  ;;  %s3315_s10 = scalar_lea.hbm %s3547_s29, 2048 }
  0x35   : > { %p3316_p11 = scmp.ne.s32.totalorder %s3547_s29, %s3315_s10  ;;  %p3317_p7 = pneg %p3551_p2 }
  0x36   : > { %s3320_s25 = scalar_lea.hbm %s4623_s0, 4096  ;;  %p3321_p13 = scmp.lt.s32.totalorder %s3547_s29, %s4623_s0 }
  0x37   : > { %p3318_p9 = pnand %p3317_p7, %p3316_p11  ;;  %p3322_p0 = scmp.lt.s32.totalorder %s3320_s25, %s3315_s10 }
  0x39   : > { %p3319_p12 = pneg %p3318_p9  ;;  %p3323_p10 = por %p3322_p0, %p3321_p13 }
  0x3b   : > { %p3324_p3 = pnand %p3323_p10, %p3319_p12 }
  0x3d   : > { %3327 = shalt.err (!%p3324_p3)
}
  0x3e   : > { %s3328_s24 = scalar_lea.vmem %s3549_s7, 2048  ;;  %s3417_s28 = smov [#allocation2]  }
  0x3f   : > { %p3329_p1 = scmp.ne.s32.totalorder %s3549_s7, %s3328_s24  ;;  %s3333_s6 = sshll.u32 %s3417_s28, 4  ;;  %s3334_s6 = int_to_ptr.vmem [resolvable:$false] %s3333_s6 }
  0x40   : > { %s3335_s12 = scalar_lea.vmem %s3334_s6, 4096  ;;  %p3336_p9 = scmp.lt.s32.totalorder %s3549_s7, %s3334_s6 }
  0x41   : > { %p3331_p6 = pnand %p3329_p1, %p3317_p7  ;;  %p3337_p5 = scmp.lt.s32.totalorder %s3335_s12, %s3328_s24 }
  0x43   : > { %p3332_p11 = pneg %p3331_p6  ;;  %p3338_p4 = por %p3337_p5, %p3336_p9 }
  0x45   : > { %p3339_p8 = pnand %p3338_p4, %p3332_p11 }
  0x47   : > { %3342 = shalt.err (!%p3339_p8)
}
  0x48   : > { %3118 = dma.hbm_to_vmem [thread:$0]  (!%p3551_p2), %s3547_s29, 2048, %s3549_s7, %s3555_s9, %s3415_s30, %s3415_s30, %s3416_s5  }
  0x49   : > { %p4640_p1 = scmp.ne.s32.totalorder %s4636_s23, 0 }
  0x4b   : > { %207 = sbr.rel (%p4640_p1) target bundleno = 733 (0x2dd), region = 36 }
  0x50   : > { %s3582_s10 = sand.u32 1, %s3403_s16   ;;  %p4641_p4 = scmp.ne.s32.totalorder %s4634_s21, 0 }
  0x51   : > { %s2584_s13 = sshll.u32 %s3582_s10, 7  ;;  %s210_s25 = scalar_lea.sflag [#allocation3], %s3582_s10 }
  0x52   : > { %s3586_s26 = scalar_lea.vmem [#allocation2], %s2584_s13 }
  0x53   : > { %3386 = dma.done.wait (%p4641_p4), %s210_s25, 2048  }
  0x54   : > { %3388 = vsyncadd (%p4641_p4), %s210_s25, 4294965248  ;;  %p4642_p6 = scmp.eq.s32.totalorder %s3467_s19, 0 }
  0x56   : > { %3390 = dma.done.wait (%p4642_p6), [#allocation6], 6144   ;;  %p4643_p8 = pmov %p4642_p6 }
  0x57   : > { %v3167_v0 = vld [vmem:[#allocation5 + $0x78] sm:$0xff]   ;;  %v3169_v2 = vld [vmem:[#allocation5 + $0x70] sm:$0xff]   ;;  %v3171_v4 = vld [vmem:[#allocation5 + $0x68] sm:$0xff]   ;;  %vm489_vm0 = vcmask 1040384   ;;  %vm490_vm1 = vsmask.f32 256 }
  0x58   : > { %3392 = vsyncadd (%p4643_p8), [#allocation6], 4294961152  ;;  %v3168_v1 = vld [vmem:[#allocation5 + $0x38] sm:$0xff]   ;;  %2808 = vmatprep.subr.bf16.mxu0 %v3167_v0  ;;  %v3170_v3 = vld [vmem:[#allocation5 + $0x30] sm:$0xff]   ;;  %vm556_vm3 = vcmask 1047552   ;;  %s2587_s29 = sshll.u32 %s3582_s10, 8 }
  0x59   : > { %2856 = vmatprep.subr.bf16.mxu1 %v3168_v1  ;;  %2809 = vmatpush3.bf16.msra.mxu0 %v3167_v0  ;;  %v3172_v5 = vld [vmem:[#allocation5 + $0x28] sm:$0xff]   ;;  %v3173_v6 = vld [vmem:[#allocation5 + $0x60] sm:$0xff]   ;;  %v3175_v8 = vld [vmem:[#allocation5 + $0x58] sm:$0xff]   ;;  %vm557_vm4 = vsmask.f32 7424  ;;  %s4439_s7 = scalar_lea.vmem [#allocation8], %s2587_s29 }
  0x5a   : > { %2857 = vmatpush3.bf16.msra.mxu1 %v3168_v1  ;;  %2810 = vmatprep.subr.bf16.mxu0 %v3169_v2  ;;  %v3174_v7 = vld [vmem:[#allocation5 + $0x20] sm:$0xff]   ;;  %v3176_v9 = vld [vmem:[#allocation5 + $0x18] sm:$0xff]   ;;  %v3177_v10 = vld [vmem:[#allocation5 + $0x50] sm:$0xff]   ;;  %s2663_s8 = sshll.u32 %s3467_s19, 12  ;;  %s2482_s9 = sshll.u32 %s4439_s7, 4  ;;  %s4578_s9 = int_to_ptr.vmem [resolvable:$true] %s2482_s9 }
  0x5b   : > { %2858 = vmatprep.subr.bf16.mxu1 %v3170_v3  ;;  %v3597_v11 = vld [vmem:[%s3586_s26] sm:$0xff]   ;;  %v3600_v12 = vld [vmem:[%s3586_s26 + $0x8] sm:$0xff]   ;;  %v3178_v13 = vld [vmem:[#allocation5 + $0x10] sm:$0xff]   ;;  %s4576_s28 = scalar_lea.hbm %s4627_s4, %s2663_s8  ;;  %s2468_s6 = scalar_lea.sflag [#allocation4], %s3582_s10 }
  0x5c   : > { %v3603_v14 = vld [vmem:[%s3586_s26 + $0x10] sm:$0xff]   ;;  %2824 = vmatprep.mubr.bf16.mxu0 %v3597_v11  ;;  %v362_v15 = vshrl.u32 %v3597_v11, 16  ;;  %v365_v16 = vshll.u32 %v3597_v11, 16  ;;  %v3179_v17 = vld [vmem:[#allocation5 + $0x48] sm:$0xff]   ;;  %v369_v18 = vshrl.u32 %v3600_v12, 16  ;;  %v3610_v19 = vld [vmem:[%s3586_s26 + $0x18] sm:$0xff]  }
  0x5d   : > { %2811 = vmatpush3.bf16.msra.mxu0 %v3169_v2  ;;  %v3180_v20 = vld [vmem:[#allocation5 + $0x8] sm:$0xff]   ;;  %v376_v22 = vshrl.u32 %v3603_v14, 16  ;;  %vm3615_vm2 = vmand %vm489_vm0, %vm490_vm1  ;;  %v3620_v24 = vld [vmem:[%s3586_s26 + $0x20] sm:$0xff]   ;;  %v372_v28 = vshll.u32 %v3600_v12, 16  ;;  %v379_v32 = vshll.u32 %v3603_v14, 16  ;;  %v383_v33 = vshrl.u32 %v3610_v19, 16 }
  0x5e   : > { %2859 = vmatpush3.bf16.msra.mxu1 %v3170_v3  ;;  %2812 = vmatprep.subr.bf16.mxu0 %v3171_v4  ;;  %v364_v21 = vrot.slane %v362_v15, 7  ;;  %v3181_v25 = vld [vmem:[#allocation5 + $0x40] sm:$0xff]   ;;  %v371_v27 = vrot.slane %v369_v18, 7  ;;  %v3185_v35 = vld [vmem:[#allocation5 + $0xb8] sm:$0xff]   ;;  %v390_v37 = vshrl.u32 %v3620_v24, 16  ;;  %v3639_v38 = vld [vmem:[%s3586_s26 + $0x28] sm:$0xff]  }
  0x5f   : > { %2860 = vmatprep.subr.bf16.mxu1 %v3172_v5  ;;  %v3182_v29 = vld [vmem:[#allocation5] sm:$0xff]   ;;  %v378_v31 = vrot.slane %v376_v22, 7  ;;  %v3642_v39 = vld [vmem:[%s3586_s26 + $0x30] sm:$0xff]   ;;  %v385_v40 = vrot.slane %v383_v33, 7  ;;  %v386_v41 = vshll.u32 %v3610_v19, 16  ;;  %v393_v46 = vshll.u32 %v3620_v24, 16  ;;  %vm3795_vm5 = vmand %vm556_vm3, %vm557_vm4 }
  0x60   : > { %v367_v26 = vor.u32 %v365_v16, %v364_v21  ;;  %v374_v34 = vor.u32 %v372_v28, %v371_v27  ;;  %v3188_v44 = vld [vmem:[#allocation5 + $0xb0] sm:$0xff]   ;;  %v392_v45 = vrot.slane %v390_v37, 7  ;;  %v3191_v48 = vld [vmem:[#allocation5 + $0xa8] sm:$0xff]   ;;  %v397_v49 = vshrl.u32 %v3639_v38, 16  ;;  %v3660_v50 = vld [vmem:[%s3586_s26 + $0x38] sm:$0xff]   ;;  %s3343_s12 = scalar_lea.vmem %s4578_s9, 4096 }
  0x61   : > { %2813 = vmatpush3.bf16.msra.mxu0 %v3171_v4  ;;  %v381_v36 = vor.u32 %v379_v32, %v378_v31  ;;  %v388_v47 = vor.u32 %v386_v41, %v385_v40  ;;  %v404_v52 = vshrl.u32 %v3642_v39, 16  ;;  %v3666_v53 = vld [vmem:[%s3586_s26 + $0x40] sm:$0xff]   ;;  %v400_v55 = vshll.u32 %v3639_v38, 16  ;;  %v3687_v1 = vld [vmem:[%s3586_s26 + $0x48] sm:$0xff]   ;;  %v3197_v2 = vld [vmem:[#allocation5 + $0x98] sm:$0xff]   ;;  %p3344_p5 = scmp.ne.s32.totalorder %s4578_s9, %s3343_s12  ;;  %p4664_p2 = scmp.ne.s32.totalorder %s4638_s14, 0 }
  0x62   : > { %2861 = vmatpush3.bf16.msra.mxu1 %v3172_v5  ;;  %2814 = vmatprep.subr.bf16.mxu0 %v3173_v6  ;;  %v492_v30 = vsel %vm3615_vm2, 0, %v367_v26  ;;  %v493_v42 = vsel %vm3615_vm2, 0, %v374_v34  ;;  %v395_v51 = vor.u32 %v393_v46, %v392_v45  ;;  %v3194_v56 = vld [vmem:[#allocation5 + $0xa0] sm:$0xff]   ;;  %v399_v57 = vrot.slane %v397_v49, 7  ;;  %v3690_v3 = vld [vmem:[%s3586_s26 + $0x50] sm:$0xff]   ;;  %v3717_v11 = vld [vmem:[%s3586_s26 + $0x58] sm:$0xff]  }
  0x63   : > { %2862 = vmatprep.subr.bf16.mxu1 %v3174_v7  ;;  %2872 = vmatprep.mubr.bf16.mxu1 %v492_v30  ;;  %v494_v43 = vsel %vm3615_vm2, 0, %v381_v36  ;;  %v495_v54 = vsel %vm3615_vm2, 0, %v388_v47  ;;  %v407_v58 = vshll.u32 %v3642_v39, 16  ;;  %v406_v60 = vrot.slane %v404_v52, 7  ;;  %v3720_v26 = vld [vmem:[%s3586_s26 + $0x60] sm:$0xff]   ;;  %v3741_v45 = vld [vmem:[%s3586_s26 + $0x68] sm:$0xff]   ;;  %p3345_p7 = pnand %p3344_p5, %p4664_p2 }
  0x64   : > { %v496_v59 = vsel %vm3615_vm2, 0, %v395_v51  ;;  %v411_v61 = vshrl.u32 %v3660_v50, 16  ;;  %v402_v62 = vor.u32 %v400_v55, %v399_v57  ;;  %v418_v0 = vshrl.u32 %v3666_v53, 16  ;;  %v3206_v30 = vld [vmem:[#allocation5 + $0x80] sm:$0xff]   ;;  %v3744_v47 = vld [vmem:[%s3586_s26 + $0x70] sm:$0xff]   ;;  %s3418_s19 = smov [#allocation8]  }
  0x65   : > { %2815 = vmatpush3.bf16.msra.mxu0 %v3173_v6  ;;  %v409_v63 = vor.u32 %v407_v58, %v406_v60  ;;  %v414_v5 = vshll.u32 %v3660_v50, 16  ;;  %v508_v6 = vrot.slane %v365_v16, 1  ;;  %v435_v34 = vshll.u32 %v3690_v3, 16  ;;  %p3346_p12 = pneg %p3345_p7  ;;  %s3347_s13 = sshll.u32 %s3418_s19, 4  ;;  %s3348_s13 = int_to_ptr.vmem [resolvable:$false] %s3347_s13 }
  0x66   : > { %2863 = vmatpush3.bf16.msra.mxu1 %v3174_v7  ;;  %2816 = vmatprep.subr.bf16.mxu0 %v3175_v8  ;;  %v413_v4 = vrot.slane %v411_v61, 7  ;;  %v497_v7 = vsel %vm3615_vm2, 0, %v402_v62  ;;  %v453_v62 = vshrl.u32 %v3741_v45, 16  ;;  %s3349_s25 = scalar_lea.vmem %s3348_s13, 8192  ;;  %p3350_p13 = scmp.lt.s32.totalorder %s4578_s9, %s3348_s13 }
  0x67   : > { %2864 = vmatprep.subr.bf16.mxu1 %v3176_v9  ;;  %p3351_p0 = scmp.lt.s32.totalorder %s3349_s25, %s3343_s12 }
  0x68   : > { %v416_v16 = vor.u32 %v414_v5, %v413_v4  ;;  %v3765_v4 = vld [vmem:[%s3586_s26 + $0x78] sm:$0xff]  }
  0x69   : > { %2817 = vmatpush3.bf16.msra.mxu0 %v3175_v8  ;;  %v421_v8 = vshll.u32 %v3666_v53, 16  ;;  %p3352_p10 = por %p3351_p0, %p3350_p13 }
  0x6a   : > { %2865 = vmatpush3.bf16.msra.mxu1 %v3176_v9  ;;  %2818 = vmatprep.subr.bf16.mxu0 %v3177_v10  ;;  %v498_v9 = vsel %vm3615_vm2, 0, %v409_v63  ;;  %v499_v27 = vsel %vm3615_vm2, 0, %v416_v16  ;;  %v463_v16 = vshll.u32 %v3744_v47, 16 }
  0x6b   : > { %2866 = vmatprep.subr.bf16.mxu1 %v3178_v13  ;;  %p3353_p3 = pnand %p3352_p10, %p3346_p12 }
  0x6d   : > { %2819 = vmatpush3.bf16.msra.mxu0 %v3177_v10  ;;  %v420_v10 = vrot.slane %v418_v0, 7 }
  0x6e   : > { %2867 = vmatpush3.bf16.msra.mxu1 %v3178_v13  ;;  %2820 = vmatprep.subr.bf16.mxu0 %v3179_v17  ;;  %v3200_v13 = vld [vmem:[#allocation5 + $0x90] sm:$0xff]  }
  0x6f   : > { %2868 = vmatprep.subr.bf16.mxu1 %v3180_v20  ;;  %v423_v21 = vor.u32 %v421_v8, %v420_v10 }
  0x71   : > { %2821 = vmatpush3.bf16.msra.mxu0 %v3179_v17  ;;  %v3706_v17 = vor.u32 %v508_v6, %v362_v15  ;;  %v3203_v15 = vld [vmem:[#allocation5 + $0x88] sm:$0xff]  }
  0x72   : > { %2869 = vmatpush3.bf16.msra.mxu1 %v3180_v20  ;;  %2822 = vmatprep.subr.bf16.mxu0 %v3181_v25  ;;  %v425_v20 = vshrl.u32 %v3687_v1, 16 }
  0x73   : > { %2870 = vmatprep.subr.bf16.mxu1 %v3182_v29 }
  0x74   : > { %v427_v31 = vrot.slane %v425_v20, 7 }
  0x75   : > { %2823 = vmatpush3.bf16.msra.mxu0 %v3181_v25  ;;  %v432_v25 = vshrl.u32 %v3690_v3, 16 }
  0x76   : > { %2871 = vmatpush3.bf16.msra.mxu1 %v3182_v29  ;;  %2904 = vmatprep.subr.bf16.mxu0 %v3185_v35  ;;  %v428_v29 = vshll.u32 %v3687_v1, 16 }
  0x77   : > { %v434_v36 = vrot.slane %v432_v25, 7 }
  0x78   : > { %2825 = vmatmul.mubr.bf16.vlgmr.msra.gmra.mxu0 %v3600_v12  ;;  %v430_v40 = vor.u32 %v428_v29, %v427_v31 }
  0x79   : > { %2873 = vmatmul.mubr.bf16.vlgmr.msra.gmra.mxu1 %v493_v42  ;;  %2905 = vmatpush3.bf16.msra.mxu0 %v3185_v35  ;;  %v500_v35 = vsel %vm3615_vm2, 0, %v423_v21  ;;  %v439_v42 = vshrl.u32 %v3717_v11, 16 }
  0x7a   : > { %2828 = vmatprep.mubr.bf16.mxu0 %v3603_v14  ;;  %2876 = vmatprep.mubr.bf16.mxu1 %v494_v43  ;;  %v437_v43 = vor.u32 %v435_v34, %v434_v36 }
  0x7b   : > { %2906 = vmatprep.subr.bf16.mxu0 %v3188_v44  ;;  %v441_v51 = vrot.slane %v439_v42, 7 }
  0x7d   : > { %2907 = vmatpush3.bf16.msra.mxu0 %v3188_v44  ;;  %v446_v44 = vshrl.u32 %v3720_v26, 16 }
  0x7e   : > { %2908 = vmatprep.subr.bf16.mxu0 %v3191_v48 }
  0x7f   : > { %v448_v57 = vrot.slane %v446_v44, 7 }
  0x80   : > { %2829 = vmatmul.mubr.bf16.gmra.mxu0 %v3610_v19 }
  0x81   : > { %2877 = vmatmul.mubr.bf16.gmra.mxu1 %v495_v54  ;;  %2832 = vmatprep.mubr.bf16.mxu0 %v3620_v24  ;;  %v442_v54 = vshll.u32 %v3717_v11, 16 }
  0x82   : > { %2880 = vmatprep.mubr.bf16.mxu1 %v496_v59  ;;  %2909 = vmatpush3.bf16.msra.mxu0 %v3191_v48  ;;  %v501_v48 = vsel %vm3615_vm2, 0, %v430_v40  ;;  %v449_v59 = vshll.u32 %v3720_v26, 16 }
  0x83   : > { %2910 = vmatprep.subr.bf16.mxu0 %v3194_v56  ;;  %v444_v60 = vor.u32 %v442_v54, %v441_v51 }
  0x84   : > { %v451_v63 = vor.u32 %v449_v59, %v448_v57  ;;  %v512_v57 = vrot.slane %v379_v32, 1  ;;  %v516_v32 = vrot.slane %v393_v46, 1  ;;  %v520_v46 = vrot.slane %v407_v58, 1 }
  0x85   : > { %v503_v6 = vsel %vm3615_vm2, 0, %v444_v60  ;;  %v524_v58 = vrot.slane %v421_v8, 1 }
  0x86   : > { %2911 = vmatpush3.bf16.msra.mxu0 %v3194_v56  ;;  %v502_v56 = vsel %vm3615_vm2, 0, %v437_v43  ;;  %v504_v10 = vsel %vm3615_vm2, 0, %v451_v63  ;;  %v4646_v43 = vmov 0  ;;  %v517_v14 = vor.u32 %v516_v32, %v390_v37 }
  0x87   : > { %2912 = vmatprep.subr.bf16.mxu0 %v3197_v2  ;;  %v4647_v43 = vsel %vm3795_vm5, 4294967295, %v4646_v43  ;;  %v521_v24 = vor.u32 %v520_v46, %v404_v52  ;;  %v522_v37 = vrot.slane %v414_v5, 1  ;;  %v526_v5 = vrot.slane %v428_v29, 1 }
  0x88   : > { %2833 = vmatmul.mubr.bf16.gmra.mxu0 %v3639_v38  ;;  %4648 = vst [vmem:[#allocation12_spill] sm:$0xff] %v4647_v43  ;;  %v530_v29 = vrot.slane %v442_v54, 1 }
  0x89   : > { %2881 = vmatmul.mubr.bf16.gmra.mxu1 %v497_v7  ;;  %2836 = vmatprep.mubr.bf16.mxu0 %v3642_v39  ;;  %v455_v7 = vrot.slane %v453_v62, 7  ;;  %v523_v38 = vor.u32 %v522_v37, %v411_v61  ;;  %v525_v39 = vor.u32 %v524_v58, %v418_v0  ;;  %v3208_v61 = vld [vmem:[#allocation7 + $0x70] sm:$0xff]  }
  0x8a   : > { %2884 = vmatprep.mubr.bf16.mxu1 %v498_v9  ;;  %2913 = vmatpush3.bf16.msra.mxu0 %v3197_v2  ;;  %v460_v2 = vshrl.u32 %v3744_v47, 16  ;;  %v456_v9 = vshll.u32 %v3741_v45, 16 }
  0x8b   : > { %2914 = vmatprep.subr.bf16.mxu0 %v3200_v13  ;;  %v566_v52 = vsel %vm3795_vm5, %v523_v38, 0  ;;  %v567_v8 = vsel %vm3795_vm5, %v525_v39, 0 }
  0x8c   : > { %v458_v21 = vor.u32 %v456_v9, %v455_v7  ;;  %v528_v7 = vrot.slane %v435_v34, 1  ;;  %v534_v54 = vrot.slane %v456_v9, 1 }
  0x8e   : > { %2915 = vmatpush3.bf16.msra.mxu0 %v3200_v13  ;;  %v462_v13 = vrot.slane %v460_v2, 7 }
  0x8f   : > { %2916 = vmatprep.subr.bf16.mxu0 %v3203_v15 }
  0x90   : > { %2837 = vmatmul.mubr.bf16.gmra.mxu0 %v3660_v50  ;;  %v527_v50 = vor.u32 %v526_v5, %v425_v20  ;;  %v3209_v20 = vld [vmem:[#allocation7 + $0x68] sm:$0xff]  }
  0x91   : > { %2885 = vmatmul.mubr.bf16.gmra.mxu1 %v499_v27  ;;  %2840 = vmatprep.mubr.bf16.mxu0 %v3666_v53  ;;  %v465_v27 = vor.u32 %v463_v16, %v462_v13  ;;  %v529_v53 = vor.u32 %v528_v7, %v432_v25  ;;  %v536_v13 = vrot.slane %v463_v16, 1 }
  0x92   : > { %2888 = vmatprep.mubr.bf16.mxu1 %v500_v35  ;;  %2917 = vmatpush3.bf16.msra.mxu0 %v3203_v15  ;;  %v467_v15 = vshrl.u32 %v3765_v4, 16  ;;  %v470_v35 = vshll.u32 %v3765_v4, 16  ;;  %v568_v0 = vsel %vm3795_vm5, %v527_v50, 0 }
  0x93   : > { %2918 = vmatprep.subr.bf16.mxu0 %v3206_v30  ;;  %v506_v36 = vsel %vm3615_vm2, 0, %v465_v27  ;;  %v569_v34 = vsel %vm3795_vm5, %v529_v53, 0  ;;  %v3214_v27 = vld [vmem:[#allocation7 + $0x30] sm:$0xff]  }
  0x94   : > { %v469_v31 = vrot.slane %v467_v15, 7  ;;  %v538_v9 = vrot.slane %v470_v35, 1 }
  0x96   : > { %2919 = vmatpush3.bf16.msra.mxu0 %v3206_v30  ;;  %v505_v30 = vsel %vm3615_vm2, 0, %v458_v21  ;;  %v472_v40 = vor.u32 %v470_v35, %v469_v31  ;;  %v3213_v21 = vld [vmem:[#allocation7 + $0x50] sm:$0xff]   ;;  %v3218_v31 = vld [vmem:[#allocation7 + $0x18] sm:$0xff]  }
  0x97   : > { %v3220_v35 = vld [vmem:[#allocation7 + $0x10] sm:$0xff]  }
  0x98   : > { %2841 = vmatmul.mubr.bf16.gmra.mxu0 %v3687_v1  ;;  %v507_v51 = vsel %vm3615_vm2, 0, %v472_v40  ;;  %v531_v1 = vor.u32 %v530_v29, %v439_v42  ;;  %v3210_v42 = vld [vmem:[#allocation7 + $0x60] sm:$0xff]   ;;  %v3221_v40 = vld [vmem:[#allocation7 + $0x8] sm:$0xff]  }
  0x99   : > { %2889 = vmatmul.mubr.bf16.gmra.mxu1 %v501_v48  ;;  %2844 = vmatprep.mubr.bf16.mxu0 %v3690_v3  ;;  %v510_v48 = vrot.slane %v372_v28, 1  ;;  %v513_v28 = vor.u32 %v512_v57, %v376_v22  ;;  %v518_v22 = vrot.slane %v400_v55, 1  ;;  %v565_v55 = vsel %vm3795_vm5, %v521_v24, 0 }
  0x9a   : > { %2892 = vmatprep.mubr.bf16.mxu1 %v502_v56  ;;  %v559_v56 = vsel %vm3795_vm5, %v3706_v17, 0  ;;  %v570_v25 = vsel %vm3795_vm5, %v531_v1, 0 }
  0x9b   : > { %v511_v60 = vor.u32 %v510_v48, %v369_v18  ;;  %v561_v17 = vsel %vm3795_vm5, %v513_v28, 0  ;;  %v519_v19 = vor.u32 %v518_v22, %v397_v49  ;;  %v3207_v49 = vld [vmem:[#allocation7 + $0x78] sm:$0xff]   ;;  %v3223_v48 = vld [vmem:[#allocation7] sm:$0xff]  }
  0x9c   : > { %2952 = vmatprep.subr.bf16.mxu1 %v3207_v49 }
  0x9d   : > { %v560_v63 = vsel %vm3795_vm5, %v511_v60, 0  ;;  %2953 = vmatpush3.bf16.msra.mxu1 %v3207_v49 }
  0x9e   : > { %2954 = vmatprep.subr.bf16.mxu1 %v3208_v61 }
  0xa0   : > { %2845 = vmatmul.mubr.bf16.gmra.mxu0 %v3717_v11  ;;  %v535_v11 = vor.u32 %v534_v54, %v453_v62  ;;  %v3211_v62 = vld [vmem:[#allocation7 + $0x58] sm:$0xff]  }
  0xa1   : > { %2893 = vmatmul.mubr.bf16.gmra.mxu1 %v503_v6  ;;  %2848 = vmatprep.mubr.bf16.mxu0 %v3720_v26  ;;  %v514_v6 = vrot.slane %v386_v41, 1  ;;  %v563_v41 = vsel %vm3795_vm5, %v517_v14, 0  ;;  %v537_v26 = vor.u32 %v536_v13, %v460_v2  ;;  %v3212_v2 = vld [vmem:[#allocation7 + $0x38] sm:$0xff]  }
  0xa2   : > { %2896 = vmatprep.mubr.bf16.mxu1 %v504_v10  ;;  %2955 = vmatpush3.bf16.msra.mxu1 %v3208_v61  ;;  %v532_v10 = vrot.slane %v449_v59, 1 }
  0xa3   : > { %v515_v12 = vor.u32 %v514_v6, %v383_v33  ;;  %v564_v33 = vsel %vm3795_vm5, %v519_v19, 0  ;;  %2956 = vmatprep.subr.bf16.mxu1 %v3209_v20  ;;  %v573_v16 = vsel %vm3795_vm5, %v537_v26, 0  ;;  %3000 = vmatprep.subr.bf16.mxu0 %v3212_v2 }
  0xa4   : > { %v533_v3 = vor.u32 %v532_v10, %v446_v44  ;;  %v572_v44 = vsel %vm3795_vm5, %v535_v11, 0 }
  0xa5   : > { %v562_v18 = vsel %vm3795_vm5, %v515_v12, 0 }
  0xa6   : > { %2957 = vmatpush3.bf16.msra.mxu1 %v3209_v20  ;;  %v571_v59 = vsel %vm3795_vm5, %v533_v3, 0 }
  0xa7   : > { %2958 = vmatprep.subr.bf16.mxu1 %v3210_v42 }
  0xa8   : > { %2849 = vmatmul.mubr.bf16.gmra.mxu0 %v3741_v45  ;;  %v539_v45 = vor.u32 %v538_v9, %v467_v15  ;;  %v3216_v15 = vld [vmem:[#allocation7 + $0x48] sm:$0xff]  }
  0xa9   : > { %2897 = vmatmul.mubr.bf16.gmra.mxu1 %v505_v30  ;;  %2852 = vmatprep.mubr.bf16.mxu0 %v3744_v47  ;;  %v3215_v30 = vld [vmem:[#allocation7 + $0x28] sm:$0xff]  }
  0xaa   : > { %2900 = vmatprep.mubr.bf16.mxu1 %v506_v36  ;;  %2959 = vmatpush3.bf16.msra.mxu1 %v3210_v42  ;;  %v574_v47 = vsel %vm3795_vm5, %v539_v45, 0  ;;  %v3219_v36 = vld [vmem:[#allocation7 + $0x40] sm:$0xff]  }
  0xab   : > { %2960 = vmatprep.subr.bf16.mxu1 %v3211_v62 }
  0xae   : > { %2961 = vmatpush3.bf16.msra.mxu1 %v3211_v62 }
  0xaf   : > { %2962 = vmatprep.subr.bf16.mxu1 %v3213_v21 }
  0xb0   : > { %2853 = vmatmul.mubr.bf16.gmra.mxu0 %v3765_v4  ;;  %v3217_v4 = vld [vmem:[#allocation7 + $0x20] sm:$0xff]  }
  0xb1   : > { %2901 = vmatmul.mubr.bf16.gmra.mxu1 %v507_v51  ;;  %2920 = vmatprep.mubr.bf16.mxu0 %v559_v56  ;;  %v3895_v51 = vld [vmem:[#allocation7 + $0xb8] sm:$0xff]  }
  0xb2   : > { %2963 = vmatpush3.bf16.msra.mxu1 %v3213_v21 }
  0xb3   : > { %2964 = vmatprep.subr.bf16.mxu1 %v3216_v15 }
  0xb6   : > { %2965 = vmatpush3.bf16.msra.mxu1 %v3216_v15 }
  0xb7   : > { %2966 = vmatprep.subr.bf16.mxu1 %v3219_v36 }
  0xb8   : > { %2921 = vmatmul.mubr.bf16.vlgmr.msra.gmra.mxu0 %v560_v63 }
  0xb9   : > { %2924 = vmatprep.mubr.bf16.mxu0 %v561_v17  ;;  %3001 = vmatpush3.bf16.msra.mxu0 %v3212_v2 }
  0xba   : > { %3002 = vmatprep.subr.bf16.mxu0 %v3214_v27  ;;  %2967 = vmatpush3.bf16.msra.mxu1 %v3219_v36 }
  0xbb   : > { %3048 = vmatprep.subr.bf16.mxu1 %v3895_v51 }
  0xbd   : > { %3003 = vmatpush3.bf16.msra.mxu0 %v3214_v27 }
  0xbe   : > { %3004 = vmatprep.subr.bf16.mxu0 %v3215_v30 }
  0xc0   : > { %2925 = vmatmul.mubr.bf16.gmra.mxu0 %v562_v18 }
  0xc1   : > { %2928 = vmatprep.mubr.bf16.mxu0 %v563_v41  ;;  %3005 = vmatpush3.bf16.msra.mxu0 %v3215_v30 }
  0xc2   : > { %3006 = vmatprep.subr.bf16.mxu0 %v3217_v4 }
  0xc5   : > { %3007 = vmatpush3.bf16.msra.mxu0 %v3217_v4  ;;  %v3973_v4 = vld [vmem:[%s4626_s3] ss:$0 sm:$0xff] }
  0xc6   : > { %3008 = vmatprep.subr.bf16.mxu0 %v3218_v31 }
  0xc8   : > { %2929 = vmatmul.mubr.bf16.gmra.mxu0 %v564_v33 }
  0xc9   : > { %2932 = vmatprep.mubr.bf16.mxu0 %v565_v55  ;;  %3009 = vmatpush3.bf16.msra.mxu0 %v3218_v31 }
  0xca   : > { %3010 = vmatprep.subr.bf16.mxu0 %v3220_v35 }
  0xcd   : > { %3011 = vmatpush3.bf16.msra.mxu0 %v3220_v35 }
  0xce   : > { %3012 = vmatprep.subr.bf16.mxu0 %v3221_v40 }
  0xd0   : > { %2933 = vmatmul.mubr.bf16.gmra.mxu0 %v566_v52 }
  0xd1   : > { %2936 = vmatprep.mubr.bf16.mxu0 %v567_v8  ;;  %3013 = vmatpush3.bf16.msra.mxu0 %v3221_v40 }
  0xd2   : > { %3014 = vmatprep.subr.bf16.mxu0 %v3223_v48 }
  0xd5   : > { %3015 = vmatpush3.bf16.msra.mxu0 %v3223_v48 }
  0xd8   : > { %2937 = vmatmul.mubr.bf16.gmra.mxu0 %v568_v0 }
  0xd9   : > { %2940 = vmatprep.mubr.bf16.mxu0 %v569_v34 }
  0xe0   : > { %2941 = vmatmul.mubr.bf16.gmra.mxu0 %v570_v25 }
  0xe1   : > { %2944 = vmatprep.mubr.bf16.mxu0 %v571_v59 }
  0xe8   : > { %2945 = vmatmul.mubr.bf16.gmra.mxu0 %v572_v44 }
  0xe9   : > { %2948 = vmatprep.mubr.bf16.mxu0 %v573_v16 }
  0xf0   : > { %2949 = vmatmul.mubr.bf16.gmra.mxu0 %v574_v47 }
 0x138   : > { %v2826_v56 = vpop.f32.mrf.mxu0 }
 0x139   : > { %v2874_v57 = vpop.f32.mrf.mxu1 }
 0x13a   : > { %v706_v60 = vpop.f32.mrf.mxu0  ;;  %v924_v47 = vadd.f32 %v2874_v57, %v2826_v56 }
 0x13b   : > { %v915_v28 = vpop.f32.mrf.mxu1 }
 0x13c   : > { %v2827_v63 = vpop.f32.mrf.mxu0  ;;  %v916_v27 = vadd.f32 %v915_v28, %v706_v60 }
 0x13d   : > { %v2875_v6 = vpop.f32.mrf.mxu1 }
 0x13e   : > { %v709_v17 = vpop.f32.mrf.mxu0  ;;  %v927_v31 = vadd.f32 %v2875_v6, %v2827_v63 }
 0x13f   : > { %v918_v12 = vpop.f32.mrf.mxu1 }
 0x140   : > { %v2830_v32 = vpop.f32.mrf.mxu0  ;;  %v919_v40 = vadd.f32 %v918_v12, %v709_v17 }
 0x141   : > { %v2878_v22 = vpop.f32.mrf.mxu1 }
 0x142   : > { %v722_v14 = vpop.f32.mrf.mxu0  ;;  %v940_v57 = vadd.f32 %v2878_v22, %v2830_v32 }
 0x143   : > { %v931_v19 = vpop.f32.mrf.mxu1 }
 0x144   : > { %v3898_v18 = vpop.f32.mrf.mxu0 }
 0x145   : > { %v2879_v37 = vpop.f32.mrf.mxu1 }
 0x146   : > { %v3900_v41 = vpop.f32.mrf.mxu0  ;;  %v943_v32 = vadd.f32 %v2879_v37, %v3898_v18  ;;  %v3224_v37 = vld [vmem:[#allocation7 + $0xb0] sm:$0xff]  }
 0x147   : > { %v934_v38 = vpop.f32.mrf.mxu1 }
 0x148   : > { %v3902_v46 = vpop.f32.mrf.mxu0 }
 0x149   : > { %v3916_v52 = vpop.f32.mrf.mxu1 }
 0x14a   : > { %v3904_v24 = vpop.f32.mrf.mxu0 }
 0x14b   : > { %v3922_v7 = vpop.f32.mrf.mxu1 }
 0x14c   : > { %v3906_v33 = vpop.f32.mrf.mxu0 }
 0x14d   : > { %v3928_v61 = vpop.f32.mrf.mxu1 }
 0x14e   : > { %v3908_v55 = vpop.f32.mrf.mxu0 }
 0x14f   : > { %v3934_v34 = vpop.f32.mrf.mxu1 }
 0x150   : > { %v3910_v58 = vpop.f32.mrf.mxu0 }
 0x151   : > { %v3940_v3 = vpop.f32.mrf.mxu1 }
 0x152   : > { %v3912_v39 = vpop.f32.mrf.mxu0 }
 0x153   : > { %v3946_v54 = vpop.f32.mrf.mxu1 }
 0x154   : > { %v3914_v49 = vpop.f32.mrf.mxu0 }
 0x155   : > { %v3952_v11 = vpop.f32.mrf.mxu1 }
 0x156   : > { %v3918_v5 = vpop.f32.mrf.mxu0 }
 0x157   : > { %v3958_v44 = vpop.f32.mrf.mxu1 }
 0x158   : > { %v3920_v8 = vpop.f32.mrf.mxu0 }
 0x159   : > { %v3964_v45 = vpop.f32.mrf.mxu1 }
 0x15a   : > { %v3924_v50 = vpop.f32.mrf.mxu0 }
 0x15b   : > { %v3968_v30 = vpop.f32.mrf.mxu1 }
 0x15c   : > { %v3926_v53 = vpop.f32.mrf.mxu0 }
 0x15e   : > { %v3930_v0 = vpop.f32.mrf.mxu0 }
 0x160   : > { %v3932_v29 = vpop.f32.mrf.mxu0 }
 0x162   : > { %v3936_v10 = vpop.f32.mrf.mxu0 }
 0x164   : > { %v3938_v1 = vpop.f32.mrf.mxu0 }
 0x166   : > { %v3942_v20 = vpop.f32.mrf.mxu0 }
 0x168   : > { %v3944_v25 = vpop.f32.mrf.mxu0 }
 0x16a   : > { %v3948_v59 = vpop.f32.mrf.mxu0 }
 0x16c   : > { %v3950_v13 = vpop.f32.mrf.mxu0 }
 0x16e   : > { %v3954_v26 = vpop.f32.mrf.mxu0 }
 0x170   : > { %v3956_v42 = vpop.f32.mrf.mxu0 }
 0x171   : > { %4649 = vst [vmem:[#allocation13_spill] sm:$0xff] %v3956_v42 }
 0x172   : > { %v3960_v9 = vpop.f32.mrf.mxu0 }
 0x173   : > { %4650 = vst [vmem:[#allocation14_spill] sm:$0xff] %v3960_v9 }
 0x174   : > { %v3962_v16 = vpop.f32.mrf.mxu0 }
 0x175   : > { %4651 = vst [vmem:[#allocation15_spill] sm:$0xff] %v3962_v16 }
 0x176   : > { %v3966_v62 = vpop.f32.mrf.mxu0 }
 0x177   : > { %4652 = vst [vmem:[#allocation16_spill] sm:$0xff] %v3966_v62  ;;  %v3976_v62 = vpop.f32.mrf.mxu1 }
 0x178   : > { %v2922_v2 = vpop.f32.mrf.mxu0 }
 0x179   : > { %v1270_v21 = vadd.f32 %v2922_v2, %v924_v47  ;;  %v932_v47 = vadd.f32 %v931_v19, %v722_v14  ;;  %v3981_v17 = vpop.f32.mrf.mxu1  ;;  %v935_v14 = vadd.f32 %v934_v38, %v3900_v41  ;;  %v956_v41 = vadd.f32 %v3916_v52, %v3902_v46 }
 0x17a   : > { %v1141_v15 = vpop.f32.mrf.mxu0 }
 0x17b   : > { %v1268_v35 = vadd.f32 %v1141_v15, %v916_v27  ;;  %v1307_v48 = vadd.f32 %v3973_v4, %v1270_v21 }
 0x17c   : > { %v2923_v36 = vpop.f32.mrf.mxu0 }
 0x17d   : > { %v1271_v43 = vadd.f32 %v2923_v36, %v927_v31  ;;  %v1305_v2 = vadd.f32 %v3973_v4, %v1268_v35  ;;  %v1339_v9 = vmax.f32 %v1307_v48, 0.0  ;;  %v3989_v35 = vpop.f32.mrf.mxu1 }
 0x17e   : > { %v1144_v56 = vpop.f32.mrf.mxu0 }
 0x17f   : > { %v1308_v60 = vadd.f32 %v3973_v4, %v1271_v43  ;;  %v1269_v28 = vadd.f32 %v1144_v56, %v919_v40  ;;  %v1337_v43 = vmax.f32 %v1305_v2, 0.0  ;;  %v4006_v2 = vpop.f32.mrf.mxu1 }
 0x180   : > { %v2926_v16 = vpop.f32.mrf.mxu0 }
 0x181   : > { %v1340_v42 = vmax.f32 %v1308_v60, 0.0  ;;  %v1306_v63 = vadd.f32 %v3973_v4, %v1269_v28  ;;  %v1274_v6 = vadd.f32 %v2926_v16, %v940_v57  ;;  %v948_v57 = vadd.f32 %v3922_v7, %v3904_v24 }
 0x182   : > { %v1157_v12 = vpop.f32.mrf.mxu0  ;;  %v959_v24 = vadd.f32 %v3928_v61, %v3906_v33  ;;  %v972_v33 = vadd.f32 %v3940_v3, %v3910_v58 }
 0x183   : > { %v3983_v21 = vpack.c.bf16 %v1340_v42, %v1339_v9  ;;  %v1338_v27 = vmax.f32 %v1306_v63, 0.0  ;;  %v1272_v15 = vadd.f32 %v1157_v12, %v932_v47  ;;  %v1311_v31 = vadd.f32 %v3973_v4, %v1274_v6 }
 0x184   : > { %v2927_v22 = vpop.f32.mrf.mxu0 }
 0x185   : > { %v1393_v19 = vshrl.u32 %v3983_v21, 16  ;;  %v1275_v16 = vadd.f32 %v2927_v22, %v943_v32  ;;  %v3991_v40 = vpack.c.bf16 %v1338_v27, %v1337_v43  ;;  %v1309_v42 = vadd.f32 %v3973_v4, %v1272_v15 }
 0x186   : > { %v1160_v36 = vpop.f32.mrf.mxu0  ;;  %v1396_v60 = vshll.u32 %v3983_v21, 16  ;;  %v1343_v28 = vmax.f32 %v1311_v31, 0.0  ;;  %v951_v31 = vadd.f32 %v3934_v34, %v3908_v55 }
 0x187   : > { %v1273_v9 = vadd.f32 %v1160_v36, %v935_v14  ;;  %v1395_v18 = vrot.slane %v1393_v19, 7  ;;  %v1312_v38 = vadd.f32 %v3973_v4, %v1275_v16  ;;  %2968 = vmatprep.mubr.bf16.mxu1 %v3991_v40  ;;  %v1386_v56 = vshrl.u32 %v3991_v40, 16  ;;  %v3225_v14 = vld [vmem:[#allocation7 + $0xa8] sm:$0xff]  }
 0x188   : > { %v2930_v48 = vpop.f32.mrf.mxu0  ;;  %2969 = vmatmul.mubr.bf16.vlgmr.msra.gmra.mxu1 %v3983_v21  ;;  %v1389_v12 = vshll.u32 %v3991_v40, 16  ;;  %v1341_v7 = vmax.f32 %v1309_v42, 0.0  ;;  %v964_v36 = vadd.f32 %v3946_v54, %v3912_v39  ;;  %v4028_v42 = vpop.f32.mrf.mxu1  ;;  %v3226_v54 = vld [vmem:[#allocation7 + $0xa0] sm:$0xff]  }
 0x189   : > { %v1310_v47 = vadd.f32 %v3973_v4, %v1273_v9  ;;  %v1344_v46 = vmax.f32 %v1312_v38, 0.0  ;;  %v1278_v52 = vadd.f32 %v2930_v48, %v956_v41  ;;  %3049 = vmatpush3.bf16.msra.mxu1 %v3895_v51  ;;  %v1388_v6 = vrot.slane %v1386_v56, 7 }
 0x18a   : > { %v1173_v63 = vpop.f32.mrf.mxu0  ;;  %v1398_v15 = vor.u32 %v1396_v60, %v1395_v18  ;;  %3050 = vmatprep.subr.bf16.mxu1 %v3224_v37 }
 0x18b   : > { %v1342_v27 = vmax.f32 %v1310_v47, 0.0  ;;  %v1276_v32 = vadd.f32 %v1173_v63, %v948_v57  ;;  %v1391_v51 = vor.u32 %v1389_v12, %v1388_v6  ;;  %v4018_v22 = vpack.c.bf16 %v1344_v46, %v1343_v28 }
 0x18c   : > { %v2931_v43 = vpop.f32.mrf.mxu0  ;;  %v1315_v9 = vadd.f32 %v3973_v4, %v1278_v52  ;;  %v1514_v39 = vsel %vm3615_vm2, 0, %v1398_v15  ;;  %v975_v6 = vadd.f32 %v3952_v11, %v3914_v49  ;;  %v967_v49 = vadd.f32 %v3958_v44, %v3918_v5 }
 0x18d   : > { %v1279_v61 = vadd.f32 %v2931_v43, %v959_v24  ;;  %v4024_v16 = vpack.c.bf16 %v1342_v27, %v1341_v7  ;;  %v1513_v41 = vsel %vm3615_vm2, 0, %v1391_v51  ;;  %3051 = vmatpush3.bf16.msra.mxu1 %v3224_v37  ;;  %v1407_v55 = vshrl.u32 %v4018_v22, 16  ;;  %v4050_v24 = vpop.f32.mrf.mxu1 }
 0x18e   : > { %v1176_v18 = vpop.f32.mrf.mxu0  ;;  %3016 = vmatprep.mubr.bf16.mxu0 %v1513_v41  ;;  %v1313_v38 = vadd.f32 %v3973_v4, %v1276_v32  ;;  %v1410_v28 = vshll.u32 %v4018_v22, 16  ;;  %3052 = vmatprep.subr.bf16.mxu1 %v3225_v14  ;;  %v1347_v7 = vmax.f32 %v1315_v9, 0.0 }
 0x18f   : > { %v1316_v34 = vadd.f32 %v3973_v4, %v1279_v61  ;;  %v1277_v58 = vadd.f32 %v1176_v18, %v951_v31  ;;  %2972 = vmatprep.mubr.bf16.mxu1 %v4024_v16  ;;  %v1400_v3 = vshrl.u32 %v4024_v16, 16  ;;  %3017 = vmatmul.mubr.bf16.vlgmr.msra.gmra.mxu0 %v1514_v39  ;;  %v1403_v37 = vshll.u32 %v4024_v16, 16  ;;  %v3227_v31 = vld [vmem:[#allocation7 + $0x98] sm:$0xff]   ;;  %v4063_v9 = vpop.f32.mrf.mxu1 }
 0x190   : > { %v2934_v48 = vpop.f32.mrf.mxu0  ;;  %v1409_v57 = vrot.slane %v1407_v55, 7  ;;  %2973 = vmatmul.mubr.bf16.gmra.mxu1 %v4018_v22 }
 0x191   : > { %v1348_v47 = vmax.f32 %v1316_v34, 0.0  ;;  %v1314_v46 = vadd.f32 %v3973_v4, %v1277_v58  ;;  %v1282_v52 = vadd.f32 %v2934_v48, %v972_v33  ;;  %v1402_v63 = vrot.slane %v1400_v3, 7  ;;  %3053 = vmatpush3.bf16.msra.mxu1 %v3225_v14  ;;  %v3228_v48 = vld [vmem:[#allocation7 + $0x90] sm:$0xff]  }
 0x192   : > { %v1189_v27 = vpop.f32.mrf.mxu0  ;;  %v1412_v51 = vor.u32 %v1410_v28, %v1409_v57  ;;  %3054 = vmatprep.subr.bf16.mxu1 %v3226_v54  ;;  %v1345_v33 = vmax.f32 %v1313_v38, 0.0  ;;  %v988_v57 = vadd.f32 %v3964_v45, %v3920_v8  ;;  %v4085_v45 = vpop.f32.mrf.mxu1 }
 0x193   : > { %v1346_v15 = vmax.f32 %v1314_v46, 0.0  ;;  %v1280_v32 = vadd.f32 %v1189_v27, %v964_v36  ;;  %v1405_v43 = vor.u32 %v1403_v37, %v1402_v63  ;;  %v4056_v18 = vpack.c.bf16 %v1348_v47, %v1347_v7 }
 0x194   : > { %v2935_v61 = vpop.f32.mrf.mxu0  ;;  %v1319_v11 = vadd.f32 %v3973_v4, %v1282_v52  ;;  %v1516_v44 = vsel %vm3615_vm2, 0, %v1412_v51  ;;  %v980_v47 = vadd.f32 %v3968_v30, %v3924_v50  ;;  %v991_v50 = vadd.f32 %v3976_v62, %v3926_v53 }
 0x195   : > { %v1283_v14 = vadd.f32 %v2935_v61, %v975_v6  ;;  %v1515_v36 = vsel %vm3615_vm2, 0, %v1405_v43  ;;  %v4065_v34 = vpack.c.bf16 %v1346_v15, %v1345_v33  ;;  %v1421_v58 = vshrl.u32 %v4056_v18, 16  ;;  %3055 = vmatpush3.bf16.msra.mxu1 %v3226_v54 }
 0x196   : > { %v1192_v41 = vpop.f32.mrf.mxu0  ;;  %3020 = vmatprep.mubr.bf16.mxu0 %v1515_v36  ;;  %v1317_v39 = vadd.f32 %v3973_v4, %v1280_v32  ;;  %3056 = vmatprep.subr.bf16.mxu1 %v3227_v31  ;;  %v1351_v63 = vmax.f32 %v1319_v11, 0.0  ;;  %v1424_v8 = vshll.u32 %v4056_v18, 16  ;;  %v3229_v11 = vld [vmem:[#allocation7 + $0x88] sm:$0xff]  }
 0x197   : > { %v1320_v38 = vadd.f32 %v3973_v4, %v1283_v14  ;;  %v1281_v5 = vadd.f32 %v1192_v41, %v967_v49  ;;  %2976 = vmatprep.mubr.bf16.mxu1 %v4065_v34  ;;  %3021 = vmatmul.mubr.bf16.gmra.mxu0 %v1516_v44  ;;  %v1414_v46 = vshrl.u32 %v4065_v34, 16  ;;  %v1423_v52 = vrot.slane %v1421_v58, 7 }
 0x198   : > { %v2938_v54 = vpop.f32.mrf.mxu0  ;;  %2977 = vmatmul.mubr.bf16.gmra.mxu1 %v4056_v18  ;;  %v1417_v32 = vshll.u32 %v4065_v34, 16  ;;  %v1349_v43 = vmax.f32 %v1317_v39, 0.0  ;;  %v983_v14 = vadd.f32 %v3981_v17, %v3930_v0  ;;  %v996_v39 = vadd.f32 %v4006_v2, %v3936_v10 }
 0x199   : > { %v1352_v6 = vmax.f32 %v1320_v38, 0.0  ;;  %v1318_v7 = vadd.f32 %v3973_v4, %v1281_v5  ;;  %v1286_v30 = vadd.f32 %v2938_v54, %v988_v57  ;;  %v1416_v15 = vrot.slane %v1414_v46, 7  ;;  %3057 = vmatpush3.bf16.msra.mxu1 %v3227_v31  ;;  %v4104_v38 = vpop.f32.mrf.mxu1 }
 0x19a   : > { %v1205_v27 = vpop.f32.mrf.mxu0  ;;  %v1426_v33 = vor.u32 %v1424_v8, %v1423_v52  ;;  %3058 = vmatprep.subr.bf16.mxu1 %v3228_v48  ;;  %v1004_v31 = vadd.f32 %v3989_v35, %v3932_v29  ;;  %v3230_v35 = vld [vmem:[#allocation7 + $0x80] sm:$0xff]  }
 0x19b   : > { %v1350_v51 = vmax.f32 %v1318_v7, 0.0  ;;  %v4092_v61 = vpack.c.bf16 %v1352_v6, %v1351_v63  ;;  %v1284_v49 = vadd.f32 %v1205_v27, %v980_v47  ;;  %v1419_v62 = vor.u32 %v1417_v32, %v1416_v15  ;;  %v1014_v15 = vpop.f32.mrf.mxu1 }
 0x19c   : > { %v2939_v53 = vpop.f32.mrf.mxu0  ;;  %v1323_v5 = vadd.f32 %v3973_v4, %v1286_v30  ;;  %v1518_v10 = vsel %vm3615_vm2, 0, %v1426_v33  ;;  %v1007_v27 = vadd.f32 %v4028_v42, %v3938_v1  ;;  %v999_v1 = vadd.f32 %v4050_v24, %v3942_v20 }
 0x19d   : > { %v1287_v36 = vadd.f32 %v2939_v53, %v991_v50  ;;  %v4100_v41 = vpack.c.bf16 %v1350_v51, %v1349_v43  ;;  %v1517_v57 = vsel %vm3615_vm2, 0, %v1419_v62  ;;  %v1435_v47 = vshrl.u32 %v4092_v61, 16  ;;  %3059 = vmatpush3.bf16.msra.mxu1 %v3228_v48 }
 0x19e   : > { %v1208_v44 = vpop.f32.mrf.mxu0  ;;  %3024 = vmatprep.mubr.bf16.mxu0 %v1517_v57  ;;  %v1321_v2 = vadd.f32 %v3973_v4, %v1284_v49  ;;  %v1438_v63 = vshll.u32 %v4092_v61, 16  ;;  %3060 = vmatprep.subr.bf16.mxu1 %v3229_v11  ;;  %v1355_v43 = vmax.f32 %v1323_v5, 0.0  ;;  %v1020_v24 = vadd.f32 %v4063_v9, %v3944_v25 }
 0x19f   : > { %v1324_v0 = vadd.f32 %v3973_v4, %v1287_v36  ;;  %v1285_v29 = vadd.f32 %v1208_v44, %v983_v14  ;;  %2980 = vmatprep.mubr.bf16.mxu1 %v4100_v41  ;;  %v1428_v17 = vshrl.u32 %v4100_v41, 16  ;;  %3025 = vmatmul.mubr.bf16.gmra.mxu0 %v1518_v10  ;;  %v1431_v52 = vshll.u32 %v4100_v41, 16 }
 0x1a0   : > { %v2942_v54 = vpop.f32.mrf.mxu0  ;;  %v1437_v48 = vrot.slane %v1435_v47, 7  ;;  %2981 = vmatmul.mubr.bf16.gmra.mxu1 %v4092_v61  ;;  %v1353_v14 = vmax.f32 %v1321_v2, 0.0 }
 0x1a1   : > { %v1356_v6 = vmax.f32 %v1324_v0, 0.0  ;;  %v1322_v7 = vadd.f32 %v3973_v4, %v1285_v29  ;;  %v1290_v50 = vadd.f32 %v2942_v54, %v1004_v31  ;;  %v1430_v30 = vrot.slane %v1428_v17, 7  ;;  %3061 = vmatpush3.bf16.msra.mxu1 %v3229_v11 }
 0x1a2   : > { %v1221_v51 = vpop.f32.mrf.mxu0  ;;  %v1440_v62 = vor.u32 %v1438_v63, %v1437_v48  ;;  %3062 = vmatprep.subr.bf16.mxu1 %v3230_v35  ;;  %v1012_v54 = vadd.f32 %v4085_v45, %v3948_v59  ;;  %v1023_v59 = vadd.f32 %v4104_v38, %v3950_v13  ;;  %v1015_v38 = vadd.f32 %v1014_v15, %v3954_v26 }
 0x1a3   : > { %v1354_v33 = vmax.f32 %v1322_v7, 0.0  ;;  %v1288_v49 = vadd.f32 %v1221_v51, %v996_v39  ;;  %v1433_v53 = vor.u32 %v1431_v52, %v1430_v30  ;;  %v4130_v36 = vpack.c.bf16 %v1356_v6, %v1355_v43  ;;  %v2902_v39 = vpop.f32.mrf.mxu1 }
 0x1a4   : > { %v2943_v31 = vpop.f32.mrf.mxu0  ;;  %v1327_v42 = vadd.f32 %v3973_v4, %v1290_v50  ;;  %v1520_v20 = vsel %vm3615_vm2, 0, %v1440_v62 }
 0x1a5   : > { %v1291_v5 = vadd.f32 %v2943_v31, %v1007_v27  ;;  %v1519_v11 = vsel %vm3615_vm2, 0, %v1433_v53  ;;  %v4137_v57 = vpack.c.bf16 %v1354_v33, %v1353_v14  ;;  %v1449_v0 = vshrl.u32 %v4130_v36, 16  ;;  %3063 = vmatpush3.bf16.msra.mxu1 %v3230_v35  ;;  %v1027_v9 = vpop.f32.mrf.mxu1 }
 0x1a6   : > { %v1224_v44 = vpop.f32.mrf.mxu0  ;;  %3028 = vmatprep.mubr.bf16.mxu0 %v1519_v11  ;;  %v1325_v29 = vadd.f32 %v3973_v4, %v1288_v49  ;;  %v1359_v7 = vmax.f32 %v1327_v42, 0.0  ;;  %v1452_v25 = vshll.u32 %v4130_v36, 16 }
 0x1a7   : > { %v1328_v10 = vadd.f32 %v3973_v4, %v1291_v5  ;;  %v1289_v2 = vadd.f32 %v1224_v44, %v999_v1  ;;  %2984 = vmatprep.mubr.bf16.mxu1 %v4137_v57  ;;  %3029 = vmatmul.mubr.bf16.gmra.mxu0 %v1520_v20  ;;  %v1442_v35 = vshrl.u32 %v4137_v57, 16  ;;  %v1451_v6 = vrot.slane %v1449_v0, 7  ;;  %v4653_v1 = vld [vmem:[#allocation13_spill] sm:$0xff]  ;;  %v4654_v44 = vld [vmem:[#allocation14_spill] sm:$0xff] }
 0x1a8   : > { %v2946_v48 = vpop.f32.mrf.mxu0  ;;  %2985 = vmatmul.mubr.bf16.gmra.mxu1 %v4130_v36  ;;  %v1445_v51 = vshll.u32 %v4137_v57, 16  ;;  %v1357_v33 = vmax.f32 %v1325_v29, 0.0  ;;  %v1036_v42 = vadd.f32 %v2902_v39, %v4653_v1  ;;  %v1028_v29 = vadd.f32 %v1027_v9, %v4654_v44 }
 0x1a9   : > { %v1360_v50 = vmax.f32 %v1328_v10, 0.0  ;;  %v1326_v30 = vadd.f32 %v3973_v4, %v1289_v2  ;;  %v1294_v45 = vadd.f32 %v2946_v48, %v1020_v24  ;;  %v1444_v43 = vrot.slane %v1442_v35, 7  ;;  %v2903_v10 = vpop.f32.mrf.mxu1 }
 0x1aa   : > { %v1237_v27 = vpop.f32.mrf.mxu0  ;;  %v1454_v53 = vor.u32 %v1452_v25, %v1451_v6 }
 0x1ab   : > { %v1358_v49 = vmax.f32 %v1326_v30, 0.0  ;;  %v4162_v62 = vpack.c.bf16 %v1360_v50, %v1359_v7  ;;  %v1292_v14 = vadd.f32 %v1237_v27, %v1012_v54  ;;  %v1447_v13 = vor.u32 %v1445_v51, %v1444_v43 }
 0x1ac   : > { %v2947_v31 = vpop.f32.mrf.mxu0  ;;  %v1331_v2 = vadd.f32 %v3973_v4, %v1294_v45  ;;  %v1522_v26 = vsel %vm3615_vm2, 0, %v1454_v53  ;;  %v1030_v53 = vpop.f32.mrf.mxu1 }
 0x1ad   : > { %v1295_v5 = vadd.f32 %v2947_v31, %v1023_v59  ;;  %v4168_v11 = vpack.c.bf16 %v1358_v49, %v1357_v33  ;;  %v1521_v24 = vsel %vm3615_vm2, 0, %v1447_v13  ;;  %v1463_v54 = vshrl.u32 %v4162_v62, 16  ;;  %v4655_v33 = vld [vmem:[#allocation15_spill] sm:$0xff] }
 0x1ae   : > { %v1240_v20 = vpop.f32.mrf.mxu0  ;;  %3032 = vmatprep.mubr.bf16.mxu0 %v1521_v24  ;;  %v1329_v39 = vadd.f32 %v3973_v4, %v1292_v14  ;;  %v1466_v59 = vshll.u32 %v4162_v62, 16  ;;  %v1039_v49 = vadd.f32 %v2903_v10, %v4655_v33  ;;  %v1363_v14 = vmax.f32 %v1331_v2, 0.0  ;;  %v4656_v24 = vld [vmem:[#allocation16_spill] sm:$0xff] }
 0x1af   : > { %v1332_v48 = vadd.f32 %v3973_v4, %v1295_v5  ;;  %v1293_v6 = vadd.f32 %v1240_v20, %v1015_v38  ;;  %2988 = vmatprep.mubr.bf16.mxu1 %v4168_v11  ;;  %v1456_v15 = vshrl.u32 %v4168_v11, 16  ;;  %3033 = vmatmul.mubr.bf16.gmra.mxu0 %v1522_v26  ;;  %v1459_v50 = vshll.u32 %v4168_v11, 16 }
 0x1b0   : > { %v2950_v7 = vpop.f32.mrf.mxu0  ;;  %v1465_v30 = vrot.slane %v1463_v54, 7  ;;  %2989 = vmatmul.mubr.bf16.gmra.mxu1 %v4162_v62  ;;  %v1361_v44 = vmax.f32 %v1329_v39, 0.0  ;;  %v1529_v33 = vrot.slane %v1389_v12, 1 }
 0x1b1   : > { %v1364_v9 = vmax.f32 %v1332_v48, 0.0  ;;  %v1330_v45 = vadd.f32 %v3973_v4, %v1293_v6  ;;  %v1298_v27 = vadd.f32 %v2950_v7, %v1036_v42  ;;  %v1458_v43 = vrot.slane %v1456_v15, 7 }
 0x1b2   : > { %v1253_v31 = vpop.f32.mrf.mxu0  ;;  %v1468_v5 = vor.u32 %v1466_v59, %v1465_v30  ;;  %v1031_v48 = vadd.f32 %v1030_v53, %v4656_v24 }
 0x1b3   : > { %v1362_v13 = vmax.f32 %v1330_v45, 0.0  ;;  %v1296_v38 = vadd.f32 %v1253_v31, %v1028_v29  ;;  %v1461_v1 = vor.u32 %v1459_v50, %v1458_v43  ;;  %v4194_v20 = vpack.c.bf16 %v1364_v9, %v1363_v14 }
 0x1b4   : > { %v2951_v42 = vpop.f32.mrf.mxu0  ;;  %v1335_v6 = vadd.f32 %v3973_v4, %v1298_v27  ;;  %v1524_v45 = vsel %vm3615_vm2, 0, %v1468_v5 }
 0x1b5   : > { %v1299_v10 = vadd.f32 %v2951_v42, %v1039_v49  ;;  %v1523_v2 = vsel %vm3615_vm2, 0, %v1461_v1  ;;  %v4200_v29 = vpack.c.bf16 %v1362_v13, %v1361_v44  ;;  %v1477_v7 = vshrl.u32 %v4194_v20, 16 }
 0x1b6   : > { %v1256_v26 = vpop.f32.mrf.mxu0  ;;  %3036 = vmatprep.mubr.bf16.mxu0 %v1523_v2  ;;  %v1333_v30 = vadd.f32 %v3973_v4, %v1296_v38  ;;  %v1367_v49 = vmax.f32 %v1335_v6, 0.0  ;;  %v1480_v31 = vshll.u32 %v4194_v20, 16 }
 0x1b7   : > { %v1336_v39 = vadd.f32 %v3973_v4, %v1299_v10  ;;  %v1297_v9 = vadd.f32 %v1256_v26, %v1031_v48  ;;  %2992 = vmatprep.mubr.bf16.mxu1 %v4200_v29  ;;  %3037 = vmatmul.mubr.bf16.gmra.mxu0 %v1524_v45  ;;  %v1470_v27 = vshrl.u32 %v4200_v29, 16  ;;  %v1479_v43 = vrot.slane %v1477_v7, 7 }
 0x1b8   : > { %2993 = vmatmul.mubr.bf16.gmra.mxu1 %v4194_v20  ;;  %v1473_v38 = vshll.u32 %v4200_v29, 16  ;;  %v1365_v1 = vmax.f32 %v1333_v30, 0.0  ;;  %v1531_v30 = vrot.slane %v1396_v60, 1 }
 0x1b9   : > { %v1368_v53 = vmax.f32 %v1336_v39, 0.0  ;;  %v1334_v14 = vadd.f32 %v3973_v4, %v1297_v9  ;;  %v1472_v13 = vrot.slane %v1470_v27, 7  ;;  %v1482_v44 = vor.u32 %v1480_v31, %v1479_v43 }
 0x1ba   : > { %v1530_v4 = vor.u32 %v1529_v33, %v1386_v56  ;;  %v1533_v43 = vrot.slane %v1403_v37, 1 }
 0x1bb   : > { %v1366_v5 = vmax.f32 %v1334_v14, 0.0  ;;  %v4221_v42 = vpack.c.bf16 %v1368_v53, %v1367_v49  ;;  %v1475_v12 = vor.u32 %v1473_v38, %v1472_v13  ;;  %v1526_v10 = vsel %vm3615_vm2, 0, %v1482_v44 }
 0x1bc   : > { %v1577_v56 = vsel %vm3795_vm5, %v1530_v4, 0  ;;  %v1532_v53 = vor.u32 %v1531_v30, %v1393_v19  ;;  %v1534_v14 = vor.u32 %v1533_v43, %v1400_v3  ;;  %v1537_v19 = vrot.slane %v1417_v32, 1 }
 0x1bd   : > { %v4227_v24 = vpack.c.bf16 %v1366_v5, %v1365_v1  ;;  %v1491_v48 = vshrl.u32 %v4221_v42, 16  ;;  %v1525_v6 = vsel %vm3615_vm2, 0, %v1475_v12  ;;  %v1494_v45 = vshll.u32 %v4221_v42, 16 }
 0x1be   : > { %3040 = vmatprep.mubr.bf16.mxu0 %v1525_v6  ;;  %v1578_v37 = vsel %vm3795_vm5, %v1532_v53, 0  ;;  %v1535_v1 = vrot.slane %v1410_v28, 1  ;;  %v1579_v21 = vsel %vm3795_vm5, %v1534_v14, 0  ;;  %v1538_v23 = vor.u32 %v1537_v19, %v1414_v46 }
 0x1bf   : > { %2996 = vmatprep.mubr.bf16.mxu1 %v4227_v24  ;;  %v1484_v2 = vshrl.u32 %v4227_v24, 16  ;;  %v1493_v26 = vrot.slane %v1491_v48, 7  ;;  %3041 = vmatmul.mubr.bf16.gmra.mxu0 %v1526_v10  ;;  %v1487_v9 = vshll.u32 %v4227_v24, 16  ;;  %v1539_v28 = vrot.slane %v1424_v8, 1 }
 0x1c0   : > { %2997 = vmatmul.mubr.bf16.gmra.mxu1 %v4221_v42  ;;  %v1536_v16 = vor.u32 %v1535_v1, %v1407_v55  ;;  %v1581_v5 = vsel %vm3795_vm5, %v1538_v23, 0  ;;  %v1541_v32 = vrot.slane %v1431_v52, 1  ;;  %v1543_v46 = vrot.slane %v1438_v63, 1 }
 0x1c1   : > { %v1486_v39 = vrot.slane %v1484_v2, 7  ;;  %3064 = vmatprep.mubr.bf16.mxu1 %v1577_v56  ;;  %v1496_v49 = vor.u32 %v1494_v45, %v1493_v26  ;;  %v1540_v22 = vor.u32 %v1539_v28, %v1421_v58  ;;  %v1545_v52 = vrot.slane %v1445_v51, 1 }
 0x1c2   : > { %v1580_v3 = vsel %vm3795_vm5, %v1536_v16, 0  ;;  %v1542_v55 = vor.u32 %v1541_v32, %v1428_v17  ;;  %v1544_v18 = vor.u32 %v1543_v46, %v1435_v47  ;;  %v1547_v17 = vrot.slane %v1452_v25, 1 }
 0x1c3   : > { %v1489_v33 = vor.u32 %v1487_v9, %v1486_v39  ;;  %v1528_v13 = vsel %vm3615_vm2, 0, %v1496_v49  ;;  %v1582_v34 = vsel %vm3795_vm5, %v1540_v22, 0  ;;  %v1546_v58 = vor.u32 %v1545_v52, %v1442_v35 }
 0x1c4   : > { %v1583_v8 = vsel %vm3795_vm5, %v1542_v55, 0  ;;  %v1584_v41 = vsel %vm3795_vm5, %v1544_v18, 0  ;;  %v1549_v51 = vrot.slane %v1459_v50, 1  ;;  %v1548_v61 = vor.u32 %v1547_v17, %v1449_v0 }
 0x1c5   : > { %v1527_v60 = vsel %vm3615_vm2, 0, %v1489_v33  ;;  %v1585_v63 = vsel %vm3795_vm5, %v1546_v58, 0  ;;  %v1551_v35 = vrot.slane %v1466_v59, 1  ;;  %v1553_v50 = vrot.slane %v1473_v38, 1 }
 0x1c6   : > { %3044 = vmatprep.mubr.bf16.mxu0 %v1527_v60  ;;  %v1550_v47 = vor.u32 %v1549_v51, %v1456_v15  ;;  %v1586_v57 = vsel %vm3795_vm5, %v1548_v61, 0  ;;  %v1555_v15 = vrot.slane %v1480_v31, 1  ;;  %v1557_v44 = vrot.slane %v1487_v9, 1 }
 0x1c7   : > { %3045 = vmatmul.mubr.bf16.gmra.mxu0 %v1528_v13  ;;  %v1552_v36 = vor.u32 %v1551_v35, %v1463_v54  ;;  %v1554_v0 = vor.u32 %v1553_v50, %v1470_v27  ;;  %v1559_v29 = vrot.slane %v1494_v45, 1 }
 0x1c8   : > { %3065 = vmatmul.mubr.bf16.vlgmr.msra.gmra.mxu1 %v1578_v37  ;;  %v1587_v25 = vsel %vm3795_vm5, %v1550_v47, 0  ;;  %v1556_v38 = vor.u32 %v1555_v15, %v1477_v7  ;;  %v1558_v62 = vor.u32 %v1557_v44, %v1484_v2 }
 0x1c9   : > { %3068 = vmatprep.mubr.bf16.mxu1 %v1579_v21  ;;  %v1588_v11 = vsel %vm3795_vm5, %v1552_v36, 0  ;;  %v1589_v59 = vsel %vm3795_vm5, %v1554_v0, 0  ;;  %v1560_v31 = vor.u32 %v1559_v29, %v1491_v48  ;;  %v4420_v36 = vld [vmem:[%s4626_s3 + $0x1] ss:$0 sm:$0xff]  ;;  %v3247_v0 = vld [vmem:[%s3586_s26 + $0x8] sm:$0xff]  }
 0x1ca   : > { %v1590_v54 = vsel %vm3795_vm5, %v1556_v38, 0  ;;  %v1591_v27 = vsel %vm3795_vm5, %v1558_v62, 0  ;;  %v3248_v62 = vld [vmem:[%s3586_s26] sm:$0xff]  }
 0x1cb   : > { %v1592_v12 = vsel %vm3795_vm5, %v1560_v31, 0 }
 0x1d0   : > { %3069 = vmatmul.mubr.bf16.gmra.mxu1 %v1580_v3 }
 0x1d1   : > { %3072 = vmatprep.mubr.bf16.mxu1 %v1581_v5 }
 0x1d8   : > { %3073 = vmatmul.mubr.bf16.gmra.mxu1 %v1582_v34 }
 0x1d9   : > { %3076 = vmatprep.mubr.bf16.mxu1 %v1583_v8 }
 0x1e0   : > { %3077 = vmatmul.mubr.bf16.gmra.mxu1 %v1584_v41 }
 0x1e1   : > { %3080 = vmatprep.mubr.bf16.mxu1 %v1585_v63 }
 0x1e8   : > { %3081 = vmatmul.mubr.bf16.gmra.mxu1 %v1586_v57 }
 0x1e9   : > { %3084 = vmatprep.mubr.bf16.mxu1 %v1587_v25 }
 0x1f0   : > { %3085 = vmatmul.mubr.bf16.gmra.mxu1 %v1588_v11  ;;  %v2341_v11 = vunpack.c.l.bf16 %v3247_v0 }
 0x1f1   : > { %3088 = vmatprep.mubr.bf16.mxu1 %v1589_v59 }
 0x1f8   : > { %3089 = vmatmul.mubr.bf16.gmra.mxu1 %v1590_v54  ;;  %v2339_v54 = vunpack.c.l.bf16 %v3248_v62 }
 0x1f9   : > { %3092 = vmatprep.mubr.bf16.mxu1 %v1591_v27 }
 0x200   : > { %3093 = vmatmul.mubr.bf16.gmra.mxu1 %v1592_v12  ;;  %v2342_v12 = vunpack.c.h.bf16 %v3247_v0  ;;  %v3249_v0 = vld [vmem:[%s3586_s26 + $0x18] sm:$0xff]  }
 0x248   : > { %v2970_v20 = vpop.f32.mrf.mxu1 }
 0x24a   : > { %v1708_v7 = vpop.f32.mrf.mxu1 }
 0x24c   : > { %v2971_v4 = vpop.f32.mrf.mxu1 }
 0x24e   : > { %v4335_v24 = vpop.f32.mrf.mxu1 }
 0x24f   : > { %v3018_v6 = vpop.f32.mrf.mxu0 }
 0x250   : > { %v4337_v10 = vpop.f32.mrf.mxu1  ;;  %v1926_v25 = vadd.f32 %v3018_v6, %v2970_v20 }
 0x251   : > { %v1917_v2 = vpop.f32.mrf.mxu0 }
 0x252   : > { %v4339_v26 = vpop.f32.mrf.mxu1  ;;  %v1918_v15 = vadd.f32 %v1917_v2, %v1708_v7 }
 0x253   : > { %v3019_v56 = vpop.f32.mrf.mxu0 }
 0x254   : > { %v4341_v30 = vpop.f32.mrf.mxu1  ;;  %v1929_v29 = vadd.f32 %v3019_v56, %v2971_v4 }
 0x255   : > { %v1920_v42 = vpop.f32.mrf.mxu0 }
 0x256   : > { %v4343_v48 = vpop.f32.mrf.mxu1  ;;  %v1921_v6 = vadd.f32 %v1920_v42, %v4335_v24 }
 0x257   : > { %v3022_v40 = vpop.f32.mrf.mxu0 }
 0x258   : > { %v4345_v39 = vpop.f32.mrf.mxu1 }
 0x259   : > { %v4347_v9 = vpop.f32.mrf.mxu0 }
 0x25a   : > { %v4349_v45 = vpop.f32.mrf.mxu1  ;;  %v1934_v24 = vadd.f32 %v4347_v9, %v4339_v26 }
 0x25b   : > { %v4353_v33 = vpop.f32.mrf.mxu0 }
 0x25c   : > { %v4351_v43 = vpop.f32.mrf.mxu1 }
 0x25d   : > { %v4359_v60 = vpop.f32.mrf.mxu0 }
 0x25e   : > { %v4355_v49 = vpop.f32.mrf.mxu1 }
 0x25f   : > { %v4365_v37 = vpop.f32.mrf.mxu0 }
 0x260   : > { %v4357_v53 = vpop.f32.mrf.mxu1 }
 0x261   : > { %v4371_v19 = vpop.f32.mrf.mxu0 }
 0x262   : > { %v4361_v14 = vpop.f32.mrf.mxu1 }
 0x263   : > { %v4377_v3 = vpop.f32.mrf.mxu0 }
 0x264   : > { %v4363_v13 = vpop.f32.mrf.mxu1 }
 0x265   : > { %v4383_v32 = vpop.f32.mrf.mxu0 }
 0x266   : > { %v4367_v1 = vpop.f32.mrf.mxu1 }
 0x267   : > { %v4389_v34 = vpop.f32.mrf.mxu0 }
 0x268   : > { %v4369_v21 = vpop.f32.mrf.mxu1 }
 0x269   : > { %v4395_v52 = vpop.f32.mrf.mxu0 }
 0x26a   : > { %v4373_v16 = vpop.f32.mrf.mxu1 }
 0x26b   : > { %v4401_v41 = vpop.f32.mrf.mxu0 }
 0x26c   : > { %v4375_v23 = vpop.f32.mrf.mxu1 }
 0x26d   : > { %v4407_v51 = vpop.f32.mrf.mxu0 }
 0x26e   : > { %v4379_v28 = vpop.f32.mrf.mxu1 }
 0x26f   : > { %v4413_v57 = vpop.f32.mrf.mxu0 }
 0x270   : > { %v4381_v5 = vpop.f32.mrf.mxu1 }
 0x271   : > { %v4423_v59 = vpop.f32.mrf.mxu0 }
 0x272   : > { %v4385_v22 = vpop.f32.mrf.mxu1 }
 0x274   : > { %v4387_v55 = vpop.f32.mrf.mxu1 }
 0x276   : > { %v4391_v46 = vpop.f32.mrf.mxu1 }
 0x278   : > { %v4393_v8 = vpop.f32.mrf.mxu1 }
 0x27a   : > { %v4397_v18 = vpop.f32.mrf.mxu1 }
 0x27c   : > { %v4399_v58 = vpop.f32.mrf.mxu1 }
 0x27e   : > { %v4403_v17 = vpop.f32.mrf.mxu1 }
 0x280   : > { %v4405_v63 = vpop.f32.mrf.mxu1 }
 0x282   : > { %v4409_v61 = vpop.f32.mrf.mxu1 }
 0x283   : > { %4658 = vst [vmem:[#allocation13_spill] sm:$0xff] %v4409_v61 }
 0x284   : > { %v4411_v47 = vpop.f32.mrf.mxu1 }
 0x285   : > { %4659 = vst [vmem:[#allocation14_spill] sm:$0xff] %v4411_v47 }
 0x286   : > { %v4415_v35 = vpop.f32.mrf.mxu1 }
 0x287   : > { %4660 = vst [vmem:[#allocation15_spill] sm:$0xff] %v4415_v35  ;;  %v4429_v35 = vpop.f32.mrf.mxu0 }
 0x288   : > { %v3066_v50 = vpop.f32.mrf.mxu1 }
 0x289   : > { %v2272_v44 = vadd.f32 %v3066_v50, %v1926_v25  ;;  %v2340_v25 = vunpack.c.h.bf16 %v3248_v62  ;;  %v1942_v50 = vadd.f32 %v3022_v40, %v4337_v10 }
 0x28a   : > { %v2143_v38 = vpop.f32.mrf.mxu1 }
 0x28b   : > { %v2309_v27 = vadd.f32 %v4420_v36, %v2272_v44  ;;  %v2270_v31 = vadd.f32 %v2143_v38, %v1918_v15  ;;  %v2345_v38 = vunpack.c.l.bf16 %v3249_v0 }
 0x28c   : > { %v3067_v20 = vpop.f32.mrf.mxu1 }
 0x28d   : > { %v2373_v47 = vadd.f32 %v2341_v11, %v2309_v27  ;;  %v2307_v7 = vadd.f32 %v4420_v36, %v2270_v31  ;;  %v2273_v2 = vadd.f32 %v3067_v20, %v1929_v29  ;;  %v4437_v11 = vpop.f32.mrf.mxu0  ;;  %v1945_v29 = vadd.f32 %v4353_v33, %v4341_v30 }
 0x28e   : > { %v2146_v61 = vpop.f32.mrf.mxu1 }
 0x28f   : > { %v2405_v4 = vmax.f32 %v2373_v47, 0.0  ;;  %v2371_v56 = vadd.f32 %v2339_v54, %v2307_v7  ;;  %v2310_v44 = vadd.f32 %v4420_v36, %v2273_v2  ;;  %v2271_v15 = vadd.f32 %v2146_v61, %v1921_v6  ;;  %v3250_v61 = vld [vmem:[%s3586_s26 + $0x10] sm:$0xff]   ;;  %v4450_v2 = vpop.f32.mrf.mxu0 }
 0x290   : > { %v3070_v42 = vpop.f32.mrf.mxu1  ;;  %v2343_v54 = vunpack.c.l.bf16 %v3250_v61  ;;  %v2346_v6 = vunpack.c.h.bf16 %v3249_v0 }
 0x291   : > { %2437 = vst [vmem:[%s4439_s7 + $0x10] sm:$0xff] %v2405_v4  ;;  %v2403_v10 = vmax.f32 %v2371_v56, 0.0  ;;  %v2374_v40 = vadd.f32 %v2342_v12, %v2310_v44  ;;  %v2308_v47 = vadd.f32 %v4420_v36, %v2271_v15  ;;  %v2276_v62 = vadd.f32 %v3070_v42, %v1942_v50 }
 0x292   : > { %v2159_v26 = vpop.f32.mrf.mxu1  ;;  %v1937_v12 = vadd.f32 %v4359_v60, %v4343_v48  ;;  %v2344_v56 = vunpack.c.h.bf16 %v3250_v61  ;;  %v3252_v61 = vld [vmem:[%s3586_s26 + $0x20] sm:$0xff]  }
 0x293   : > { %2435 = vst [vmem:[%s4439_s7] sm:$0xff] %v2403_v10  ;;  %v2406_v9 = vmax.f32 %v2374_v40, 0.0  ;;  %v2372_v27 = vadd.f32 %v2340_v25, %v2308_v47  ;;  %v2313_v31 = vadd.f32 %v4420_v36, %v2276_v62  ;;  %v2274_v20 = vadd.f32 %v2159_v26, %v1934_v24  ;;  %v3251_v24 = vld [vmem:[%s3586_s26 + $0x28] sm:$0xff]   ;;  %v4461_v40 = vpop.f32.mrf.mxu0 }
 0x294   : > { %v3071_v7 = vpop.f32.mrf.mxu1  ;;  %v1958_v25 = vadd.f32 %v4365_v37, %v4345_v39  ;;  %v2349_v42 = vunpack.c.l.bf16 %v3251_v24 }
 0x295   : > { %2438 = vst [vmem:[%s4439_s7 + $0x18] sm:$0xff] %v2406_v9  ;;  %v2404_v50 = vmax.f32 %v2372_v27, 0.0  ;;  %v2377_v4 = vadd.f32 %v2345_v38, %v2313_v31  ;;  %v2311_v30 = vadd.f32 %v4420_v36, %v2274_v20  ;;  %v2277_v33 = vadd.f32 %v3071_v7, %v1945_v29 }
 0x296   : > { %v2162_v44 = vpop.f32.mrf.mxu1  ;;  %v1950_v38 = vadd.f32 %v4371_v19, %v4349_v45  ;;  %v1961_v29 = vadd.f32 %v4377_v3, %v4351_v43  ;;  %v2350_v31 = vunpack.c.h.bf16 %v3251_v24  ;;  %v1953_v20 = vadd.f32 %v4383_v32, %v4355_v49 }
 0x297   : > { %2436 = vst [vmem:[%s4439_s7 + $0x8] sm:$0xff] %v2404_v50  ;;  %v2409_v15 = vmax.f32 %v2377_v4, 0.0  ;;  %v2375_v48 = vadd.f32 %v2343_v54, %v2311_v30  ;;  %v2314_v60 = vadd.f32 %v4420_v36, %v2277_v33  ;;  %v2275_v0 = vadd.f32 %v2162_v44, %v1937_v12  ;;  %v4472_v12 = vpop.f32.mrf.mxu0  ;;  %v3253_v44 = vld [vmem:[%s3586_s26 + $0x38] sm:$0xff]  }
 0x298   : > { %v3074_v10 = vpop.f32.mrf.mxu1  ;;  %v2347_v54 = vunpack.c.l.bf16 %v3252_v61  ;;  %v2348_v4 = vunpack.c.h.bf16 %v3252_v61  ;;  %v1974_v30 = vadd.f32 %v4389_v34, %v4357_v53  ;;  %v2354_v61 = vunpack.c.h.bf16 %v3253_v44 }
 0x299   : > { %2441 = vst [vmem:[%s4439_s7 + $0x30] sm:$0xff] %v2409_v15  ;;  %v2407_v47 = vmax.f32 %v2375_v48, 0.0  ;;  %v2378_v39 = vadd.f32 %v2346_v6, %v2314_v60  ;;  %v2312_v37 = vadd.f32 %v4420_v36, %v2275_v0  ;;  %v2280_v62 = vadd.f32 %v3074_v10, %v1958_v25  ;;  %v4483_v0 = vpop.f32.mrf.mxu0 }
 0x29a   : > { %v2175_v26 = vpop.f32.mrf.mxu1  ;;  %v2353_v15 = vunpack.c.l.bf16 %v3253_v44  ;;  %v1966_v48 = vadd.f32 %v4395_v52, %v4361_v14 }
 0x29b   : > { %2439 = vst [vmem:[%s4439_s7 + $0x20] sm:$0xff] %v2407_v47  ;;  %v2410_v9 = vmax.f32 %v2378_v39, 0.0  ;;  %v2376_v45 = vadd.f32 %v2344_v56, %v2312_v37  ;;  %v2317_v19 = vadd.f32 %v4420_v36, %v2280_v62  ;;  %v2278_v27 = vadd.f32 %v2175_v26, %v1950_v38  ;;  %v3254_v38 = vld [vmem:[%s3586_s26 + $0x30] sm:$0xff]   ;;  %v4494_v26 = vpop.f32.mrf.mxu0 }
 0x29c   : > { %v3075_v6 = vpop.f32.mrf.mxu1  ;;  %v2351_v10 = vunpack.c.l.bf16 %v3254_v38  ;;  %v1977_v47 = vadd.f32 %v4401_v41, %v4363_v13 }
 0x29d   : > { %2442 = vst [vmem:[%s4439_s7 + $0x38] sm:$0xff] %v2410_v9  ;;  %v2408_v7 = vmax.f32 %v2376_v45, 0.0  ;;  %v2381_v50 = vadd.f32 %v2349_v42, %v2317_v19  ;;  %v2315_v43 = vadd.f32 %v4420_v36, %v2278_v27  ;;  %v2281_v3 = vadd.f32 %v3075_v6, %v1961_v29 }
 0x29e   : > { %v2178_v33 = vpop.f32.mrf.mxu1  ;;  %v2352_v19 = vunpack.c.h.bf16 %v3254_v38  ;;  %v1990_v27 = vadd.f32 %v4413_v57, %v4369_v21 }
 0x29f   : > { %2440 = vst [vmem:[%s4439_s7 + $0x28] sm:$0xff] %v2408_v7  ;;  %v2413_v56 = vmax.f32 %v2381_v50, 0.0  ;;  %v2379_v49 = vadd.f32 %v2347_v54, %v2315_v43  ;;  %v2318_v32 = vadd.f32 %v4420_v36, %v2281_v3  ;;  %v2279_v25 = vadd.f32 %v2178_v33, %v1953_v20  ;;  %v3255_v7 = vld [vmem:[%s3586_s26 + $0x48] sm:$0xff]  }
 0x2a0   : > { %v3078_v60 = vpop.f32.mrf.mxu1  ;;  %v1969_v54 = vadd.f32 %v4407_v51, %v4367_v1  ;;  %v2357_v50 = vunpack.c.l.bf16 %v3255_v7  ;;  %v1982_v43 = vadd.f32 %v4423_v59, %v4373_v16 }
 0x2a1   : > { %2445 = vst [vmem:[%s4439_s7 + $0x50] sm:$0xff] %v2413_v56  ;;  %v2411_v24 = vmax.f32 %v2379_v49, 0.0  ;;  %v2382_v53 = vadd.f32 %v2350_v31, %v2318_v32  ;;  %v2316_v34 = vadd.f32 %v4420_v36, %v2279_v25  ;;  %v2284_v42 = vadd.f32 %v3078_v60, %v1974_v30  ;;  %v3256_v56 = vld [vmem:[%s3586_s26 + $0x40] sm:$0xff]  }
 0x2a2   : > { %v2191_v39 = vpop.f32.mrf.mxu1  ;;  %v2355_v49 = vunpack.c.l.bf16 %v3256_v56  ;;  %v1993_v32 = vadd.f32 %v4429_v35, %v4375_v23  ;;  %v1985_v60 = vadd.f32 %v4437_v11, %v4379_v28  ;;  %v2356_v38 = vunpack.c.h.bf16 %v3256_v56 }
 0x2a3   : > { %2443 = vst [vmem:[%s4439_s7 + $0x40] sm:$0xff] %v2411_v24  ;;  %v2414_v37 = vmax.f32 %v2382_v53, 0.0  ;;  %v2380_v14 = vadd.f32 %v2348_v4, %v2316_v34  ;;  %v2321_v52 = vadd.f32 %v4420_v36, %v2284_v42  ;;  %v2282_v62 = vadd.f32 %v2191_v39, %v1966_v48  ;;  %v4505_v4 = vpop.f32.mrf.mxu0 }
 0x2a4   : > { %v3079_v29 = vpop.f32.mrf.mxu1  ;;  %v2358_v48 = vunpack.c.h.bf16 %v3255_v7 }
 0x2a5   : > { %2446 = vst [vmem:[%s4439_s7 + $0x58] sm:$0xff] %v2414_v37  ;;  %v2412_v9 = vmax.f32 %v2380_v14, 0.0  ;;  %v2385_v45 = vadd.f32 %v2353_v15, %v2321_v52  ;;  %v2319_v13 = vadd.f32 %v4420_v36, %v2282_v62  ;;  %v2285_v41 = vadd.f32 %v3079_v29, %v1977_v47  ;;  %v3043_v53 = vpop.f32.mrf.mxu0  ;;  %v3257_v14 = vld [vmem:[%s3586_s26 + $0x58] sm:$0xff]  }
 0x2a6   : > { %v2194_v31 = vpop.f32.mrf.mxu1  ;;  %v2361_v52 = vunpack.c.l.bf16 %v3257_v14  ;;  %v1998_v62 = vadd.f32 %v4461_v40, %v4385_v22 }
 0x2a7   : > { %2444 = vst [vmem:[%s4439_s7 + $0x48] sm:$0xff] %v2412_v9  ;;  %v2417_v20 = vmax.f32 %v2385_v45, 0.0  ;;  %v2383_v1 = vadd.f32 %v2351_v10, %v2319_v13  ;;  %v2322_v51 = vadd.f32 %v4420_v36, %v2285_v41  ;;  %v2283_v6 = vadd.f32 %v2194_v31, %v1969_v54  ;;  %v2016_v54 = vpop.f32.mrf.mxu0  ;;  %v3258_v45 = vld [vmem:[%s3586_s26 + $0x50] sm:$0xff]  }
 0x2a8   : > { %v3082_v3 = vpop.f32.mrf.mxu1  ;;  %v2006_v10 = vadd.f32 %v4450_v2, %v4381_v5  ;;  %v2359_v13 = vunpack.c.l.bf16 %v3258_v45  ;;  %v2009_v41 = vadd.f32 %v4472_v12, %v4387_v55 }
 0x2a9   : > { %2449 = vst [vmem:[%s4439_s7 + $0x70] sm:$0xff] %v2417_v20  ;;  %v2415_v30 = vmax.f32 %v2383_v1, 0.0  ;;  %v2386_v21 = vadd.f32 %v2354_v61, %v2322_v51  ;;  %v2320_v57 = vadd.f32 %v4420_v36, %v2283_v6  ;;  %v2288_v33 = vadd.f32 %v3082_v3, %v1990_v27  ;;  %v3046_v6 = vpop.f32.mrf.mxu0 }
 0x2aa   : > { %v2207_v25 = vpop.f32.mrf.mxu1  ;;  %v2362_v20 = vunpack.c.h.bf16 %v3257_v14  ;;  %v2001_v1 = vadd.f32 %v4483_v0, %v4391_v46  ;;  %v2022_v3 = vadd.f32 %v4494_v26, %v4393_v8 }
 0x2ab   : > { %2447 = vst [vmem:[%s4439_s7 + $0x60] sm:$0xff] %v2415_v30  ;;  %v2418_v44 = vmax.f32 %v2386_v21, 0.0  ;;  %v2384_v16 = vadd.f32 %v2352_v19, %v2320_v57  ;;  %v2325_v59 = vadd.f32 %v4420_v36, %v2288_v33  ;;  %v2286_v15 = vadd.f32 %v2207_v25, %v1982_v43  ;;  %v3259_v33 = vld [vmem:[%s3586_s26 + $0x68] sm:$0xff]   ;;  %v2029_v25 = vpop.f32.mrf.mxu0 }
 0x2ac   : > { %v3083_v24 = vpop.f32.mrf.mxu1  ;;  %v2360_v43 = vunpack.c.h.bf16 %v3258_v45  ;;  %v2365_v56 = vunpack.c.l.bf16 %v3259_v33 }
 0x2ad   : > { %2450 = vst [vmem:[%s4439_s7 + $0x78] sm:$0xff] %v2418_v44  ;;  %v2416_v34 = vmax.f32 %v2384_v16, 0.0  ;;  %v2389_v42 = vadd.f32 %v2357_v50, %v2325_v59  ;;  %v2323_v23 = vadd.f32 %v4420_v36, %v2286_v15  ;;  %v2289_v35 = vadd.f32 %v3083_v24, %v1993_v32  ;;  %v3260_v59 = vld [vmem:[%s3586_s26 + $0x60] sm:$0xff]  }
 0x2ae   : > { %v2210_v47 = vpop.f32.mrf.mxu1  ;;  %v2363_v15 = vunpack.c.l.bf16 %v3260_v59 }
 0x2af   : > { %2448 = vst [vmem:[%s4439_s7 + $0x68] sm:$0xff] %v2416_v34  ;;  %v2421_v39 = vmax.f32 %v2389_v42, 0.0  ;;  %v2387_v37 = vadd.f32 %v2355_v49, %v2323_v23  ;;  %v2326_v28 = vadd.f32 %v4420_v36, %v2289_v35  ;;  %v2287_v11 = vadd.f32 %v2210_v47, %v1985_v60 }
 0x2b0   : > { %v3086_v61 = vpop.f32.mrf.mxu1  ;;  %v2014_v49 = vadd.f32 %v4505_v4, %v4397_v18  ;;  %v2366_v42 = vunpack.c.h.bf16 %v3259_v33  ;;  %v2017_v23 = vadd.f32 %v2016_v54, %v4403_v17  ;;  %v4661_v54 = vld [vmem:[#allocation13_spill] sm:$0xff] }
 0x2b1   : > { %2453 = vst [vmem:[%s4439_s7 + $0x90] sm:$0xff] %v2421_v39  ;;  %v2419_v29 = vmax.f32 %v2387_v37, 0.0  ;;  %v2390_v9 = vadd.f32 %v2358_v48, %v2326_v28  ;;  %v2324_v5 = vadd.f32 %v4420_v36, %v2287_v11  ;;  %v2292_v2 = vadd.f32 %v3086_v61, %v2006_v10 }
 0x2b2   : > { %v2223_v19 = vpop.f32.mrf.mxu1  ;;  %v2025_v48 = vadd.f32 %v3043_v53, %v4399_v58  ;;  %v2364_v39 = vunpack.c.h.bf16 %v3260_v59  ;;  %v2038_v37 = vadd.f32 %v3046_v6, %v4405_v63 }
 0x2b3   : > { %2451 = vst [vmem:[%s4439_s7 + $0x80] sm:$0xff] %v2419_v29  ;;  %v2422_v27 = vmax.f32 %v2390_v9, 0.0  ;;  %v2388_v31 = vadd.f32 %v2356_v38, %v2324_v5  ;;  %v2329_v22 = vadd.f32 %v4420_v36, %v2292_v2  ;;  %v2290_v40 = vadd.f32 %v2223_v19, %v1998_v62  ;;  %v3047_v38 = vpop.f32.mrf.mxu0  ;;  %v3261_v62 = vld [vmem:[%s3586_s26 + $0x78] sm:$0xff]  }
 0x2b4   : > { %v3087_v51 = vpop.f32.mrf.mxu1  ;;  %v2369_v61 = vunpack.c.l.bf16 %v3261_v62  ;;  %v2030_v29 = vadd.f32 %v2029_v25, %v4661_v54  ;;  %v2370_v6 = vunpack.c.h.bf16 %v3261_v62 }
 0x2b5   : > { %2454 = vst [vmem:[%s4439_s7 + $0x98] sm:$0xff] %v2422_v27  ;;  %v2420_v7 = vmax.f32 %v2388_v31, 0.0  ;;  %v2393_v50 = vadd.f32 %v2361_v52, %v2329_v22  ;;  %v2327_v55 = vadd.f32 %v4420_v36, %v2290_v40  ;;  %v2293_v12 = vadd.f32 %v3087_v51, %v2009_v41  ;;  %v2032_v5 = vpop.f32.mrf.mxu0  ;;  %v3262_v41 = vld [vmem:[%s3586_s26 + $0x70] sm:$0xff]  }
 0x2b6   : > { %v2226_v30 = vpop.f32.mrf.mxu1  ;;  %v2367_v19 = vunpack.c.l.bf16 %v3262_v41  ;;  %v4662_v27 = vld [vmem:[#allocation14_spill] sm:$0xff] }
 0x2b7   : > { %2452 = vst [vmem:[%s4439_s7 + $0x88] sm:$0xff] %v2420_v7  ;;  %v2425_v21 = vmax.f32 %v2393_v50, 0.0  ;;  %v2391_v57 = vadd.f32 %v2359_v13, %v2327_v55  ;;  %v2330_v46 = vadd.f32 %v4420_v36, %v2293_v12  ;;  %v2291_v0 = vadd.f32 %v2226_v30, %v2001_v1  ;;  %v4663_v7 = vld [vmem:[#allocation15_spill] sm:$0xff] }
 0x2b8   : > { %v3090_v32 = vpop.f32.mrf.mxu1  ;;  %v2041_v31 = vadd.f32 %v3047_v38, %v4662_v27  ;;  %v2033_v50 = vadd.f32 %v2032_v5, %v4663_v7 }
 0x2b9   : > { %2457 = vst [vmem:[%s4439_s7 + $0xb0] sm:$0xff] %v2425_v21  ;;  %v2423_v44 = vmax.f32 %v2391_v57, 0.0  ;;  %v2394_v16 = vadd.f32 %v2362_v20, %v2330_v46  ;;  %v2328_v8 = vadd.f32 %v4420_v36, %v2291_v0  ;;  %v2296_v26 = vadd.f32 %v3090_v32, %v2022_v3 }
 0x2ba   : > { %v2239_v60 = vpop.f32.mrf.mxu1  ;;  %v2368_v21 = vunpack.c.h.bf16 %v3262_v41 }
 0x2bb   : > { %2455 = vst [vmem:[%s4439_s7 + $0xa0] sm:$0xff] %v2423_v44  ;;  %v2426_v24 = vmax.f32 %v2394_v16, 0.0  ;;  %v2392_v34 = vadd.f32 %v2360_v43, %v2328_v8  ;;  %v2333_v18 = vadd.f32 %v4420_v36, %v2296_v26  ;;  %v2294_v4 = vadd.f32 %v2239_v60, %v2014_v49 }
 0x2bc   : > { %v3091_v35 = vpop.f32.mrf.mxu1 }
 0x2bd   : > { %2458 = vst [vmem:[%s4439_s7 + $0xb8] sm:$0xff] %v2426_v24  ;;  %v2424_v10 = vmax.f32 %v2392_v34, 0.0  ;;  %v2397_v47 = vadd.f32 %v2365_v56, %v2333_v18  ;;  %v2331_v58 = vadd.f32 %v4420_v36, %v2294_v4  ;;  %v2297_v53 = vadd.f32 %v3091_v35, %v2025_v48 }
 0x2be   : > { %v2242_v28 = vpop.f32.mrf.mxu1 }
 0x2bf   : > { %2456 = vst [vmem:[%s4439_s7 + $0xa8] sm:$0xff] %v2424_v10  ;;  %v2429_v11 = vmax.f32 %v2397_v47, 0.0  ;;  %v2395_v14 = vadd.f32 %v2363_v15, %v2331_v58  ;;  %v2334_v17 = vadd.f32 %v4420_v36, %v2297_v53  ;;  %v2295_v52 = vadd.f32 %v2242_v28, %v2017_v23 }
 0x2c0   : > { %v3094_v9 = vpop.f32.mrf.mxu1 }
 0x2c1   : > { %2461 = vst [vmem:[%s4439_s7 + $0xd0] sm:$0xff] %v2429_v11  ;;  %v2427_v2 = vmax.f32 %v2395_v14, 0.0  ;;  %v2398_v45 = vadd.f32 %v2366_v42, %v2334_v17  ;;  %v2332_v63 = vadd.f32 %v4420_v36, %v2295_v52  ;;  %v2300_v13 = vadd.f32 %v3094_v9, %v2038_v37 }
 0x2c2   : > { %v2255_v22 = vpop.f32.mrf.mxu1 }
 0x2c3   : > { %2459 = vst [vmem:[%s4439_s7 + $0xc0] sm:$0xff] %v2427_v2  ;;  %v2430_v40 = vmax.f32 %v2398_v45, 0.0  ;;  %v2396_v20 = vadd.f32 %v2364_v39, %v2332_v63  ;;  %v2337_v1 = vadd.f32 %v4420_v36, %v2300_v13  ;;  %v2298_v51 = vadd.f32 %v2255_v22, %v2030_v29 }
 0x2c4   : > { %v3095_v55 = vpop.f32.mrf.mxu1 }
 0x2c5   : > { %2462 = vst [vmem:[%s4439_s7 + $0xd8] sm:$0xff] %v2430_v40  ;;  %v2428_v12 = vmax.f32 %v2396_v20, 0.0  ;;  %v2401_v43 = vadd.f32 %v2369_v61, %v2337_v1  ;;  %v2335_v3 = vadd.f32 %v4420_v36, %v2298_v51  ;;  %v2301_v30 = vadd.f32 %v3095_v55, %v2041_v31 }
 0x2c6   : > { %v2258_v57 = vpop.f32.mrf.mxu1 }
 0x2c7   : > { %2460 = vst [vmem:[%s4439_s7 + $0xc8] sm:$0xff] %v2428_v12  ;;  %v2433_v46 = vmax.f32 %v2401_v43, 0.0  ;;  %v2399_v0 = vadd.f32 %v2367_v19, %v2335_v3  ;;  %v2338_v33 = vadd.f32 %v4420_v36, %v2301_v30  ;;  %v2299_v56 = vadd.f32 %v2258_v57, %v2033_v50 }
 0x2c9   : > { %2465 = vst [vmem:[%s4439_s7 + $0xf0] sm:$0xff] %v2433_v46  ;;  %v2431_v49 = vmax.f32 %v2399_v0, 0.0  ;;  %v2402_v32 = vadd.f32 %v2370_v6, %v2338_v33  ;;  %v2336_v25 = vadd.f32 %v4420_v36, %v2299_v56 }
 0x2cb   : > { %2463 = vst [vmem:[%s4439_s7 + $0xe0] sm:$0xff] %v2431_v49  ;;  %v2434_v44 = vmax.f32 %v2402_v32, 0.0  ;;  %v2400_v16 = vadd.f32 %v2368_v21, %v2336_v25 }
 0x2cd   : > { %2466 = vst [vmem:[%s4439_s7 + $0xf8] sm:$0xff] %v2434_v44  ;;  %v2432_v8 = vmax.f32 %v2400_v16, 0.0 }
 0x2cf   : > { %2464 = vst [vmem:[%s4439_s7 + $0xe8] sm:$0xff] %v2432_v8 }
 0x2d0   : > { %3356 = shalt.err (!%p3353_p3)
}
 0x2d1   : > { %s3357_s26 = scalar_lea.hbm %s4576_s28, 4096  ;;  %s3361_s30 = scalar_lea.hbm %s4627_s4, 8192 }
 0x2d2   : > { %p3358_p11 = scmp.ne.s32.totalorder %s4576_s28, %s3357_s26  ;;  %p3362_p4 = scmp.lt.s32.totalorder %s4576_s28, %s4627_s4 }
 0x2d3   : > { %p3363_p6 = scmp.lt.s32.totalorder %s3361_s30, %s3357_s26 }
 0x2d4   : > { %p3359_p9 = pnand %p3358_p11, %p4664_p2 }
 0x2d5   : > { %p3364_p8 = por %p3363_p6, %p3362_p4 }
 0x2d6   : > { %p3360_p1 = pneg %p3359_p9 }
 0x2d8   : > { %p3365_p5 = pnand %p3364_p8, %p3360_p1 }
 0x2da   : > { %3368 = shalt.err (!%p3365_p5)
}
 0x2db   : > { %s3419_s7 = smov 128   ;;  %s3420_s8 = smov 8  }
 0x2dc   : > { %3106 = dma.vmem_to_hbm [thread:$0]  (%p4664_p2), %s4578_s9, 4096, %s4576_s28, %s2468_s6, %s3419_s7, %s3419_s7, %s3420_s8  }
 0x2dd PF: > { %s2497_s27 = sand.u32 1, %s3399_s15   ;;  %p4665_p7 = scmp.ne.s32.totalorder %s4635_s22, 0 }
 0x2de   : > { %p4666_p12 = scmp.ge.s32.totalorder %s3411_s18, 2  ;;  %s2498_s24 = scalar_lea.sflag [#allocation4], %s2497_s27 }
 0x2e0   : > { %p3120_p13 = pnand %p4666_p12, %p4665_p7 }
 0x2e2   : > { %p3121_p0 = pneg %p3120_p13 }
 0x2e4   : > { %3394 = dma.done.wait (%p3121_p0), %s2498_s24, 4096  }
 0x2e5   : > { %3396 = vsyncadd (%p3121_p0), %s2498_s24, 4294963200  ;;  %p18_p10 = scmp.ge.s32.totalorder %s3524_s11, 4   ;;  %s4667_s15 = smov %s3403_s16 }
 0x2e6   : > { %s4668_s16 = smov %s3407_s17  ;;  %s4669_s17 = smov %s3540_s20 }
 0x2e7   : > { %s4670_s18 = smov %s3524_s11  ;;  %20 = sbr.rel (!%p18_p10) target bundleno = 6 (0x6), region = 93 }
 0x2ec   :  { %2503 = vsyncpa [#allocation3], 1 }
 0x2ed   :  { %2505 = vsyncpa [#allocation3 + $0x1], 1 }
 0x2ee   :  { %2506 = vsyncpa [#allocation6], 1 }
 0x2ef   :  { %2507 = vsyncpa [#allocation4], 1 }
 0x2f0   :  { %2509 = vsyncpa [#allocation4 + $0x1], 1 }

</bundles_post_ra>
